<compile_context>
chip_gen: v7x
topology: tpu7x:2x2x1
jax: 0.10.0
libtpu: 0.0.40
codegen_flags: <defaults>
</compile_context>

<pallas_src>
import functools

import numpy as np
import jax
import jax.numpy as jnp
from jax import lax
from jax.experimental import pallas as pl
from jax.experimental.pallas import tpu as pltpu

BN_EPS = 1e-5


def _dilconv_fused_kernel(x_ref, dwcol_ref, mask_ref, pw_ref, gamma_ref, beta_ref,
                          o_ref, xpad_ref, acc_ref,
                          *, n_img, c_in, c_out, height, width, ksize, dil, pad,
                          marg_l, marg_r):
    """Fused ReLU + depthwise dilated conv + 1x1 conv + training-mode BatchNorm.

    Layouts (all lane-dense):
      x_ref:     (N*C_in,  H*W)                 VMEM  input slabs (NCHW flattened)
      dwcol_ref: (N*C_in,  K*K)                 VMEM  per-row depthwise tap weights
      mask_ref:  (K*K,     H*W)                 VMEM  per-tap in-image masks (== zero pad)
      pw_ref:    (C_in, C_out)                  SMEM  1x1 conv weights (scalar reads)
      gamma_ref: (C_out,)                       SMEM  BN gamma
      beta_ref:  (C_out,)                       SMEM  BN beta
      o_ref:     (N*C_out, H*W)                 VMEM  output slabs (pre-BN staged here)
      xpad_ref:  (N*C_in, marg_l+H*W+marg_r)    VMEM  zero-margin ReLU(x) scratch
      acc_ref:   (N*C_in,  H*W)                 VMEM  depthwise conv result
    """
    hw = height * width
    nc = n_img * c_in

    # ReLU into the margin scratch.  Only the margins are zeroed (interior is
    # fully overwritten); single fused invocation -> this runs exactly once.
    xpad_ref[:, 0:marg_l] = jnp.zeros((nc, marg_l), jnp.float32)
    xpad_ref[:, marg_l + hw:marg_l + hw + marg_r] = jnp.zeros((nc, marg_r), jnp.float32)
    xpad_ref[:, marg_l:marg_l + hw] = jnp.maximum(x_ref[...].astype(jnp.float32), 0.0)

    # Depthwise dilated conv: static tap loop.  Each tap is a static lane-offset
    # window of the scratch times a per-row (= per-channel) weight column and a
    # per-lane in-image mask row.  All FMAs run on fully packed (N*C, H*W) vregs.
    acc = jnp.zeros((nc, hw), jnp.float32)
    for i in range(ksize):
        for j in range(ksize):
            t = i * ksize + j
            shift = (i * dil - pad) * width + (j * dil - pad)
            patch = xpad_ref[:, marg_l + shift:marg_l + shift + hw]   # (N*C, H*W)
            w_col = dwcol_ref[:, t:t + 1]                             # (N*C, 1)
            m_row = mask_ref[t:t + 1, :]                              # (1,  H*W)
            acc = acc + patch * w_col * m_row
    acc_ref[...] = acc

    # Pointwise 1x1 conv: per-image channel mix as a static scalar-FMA loop
    # (C_in=4 -> the MXU would sit at <1% utilisation).  Pre-BN y is staged in
    # the output VMEM block: no extra scratch, no HBM round trip.
    for n in range(n_img):
        rows = [acc_ref[n * c_in + c:n * c_in + c + 1, :] for c in range(c_in)]
        for co in range(c_out):
            yrow = rows[0] * pw_ref[0, co]
            for c in range(1, c_in):
                yrow = yrow + rows[c] * pw_ref[c, co]
            o_ref[n * c_out + co:n * c_out + co + 1, :] = yrow

    # Training-mode BatchNorm: centred two-pass statistics (better conditioned
    # than E[y^2]-E[y]^2), finalised and applied fully in-kernel, in place.
    inv_cnt = 1.0 / float(n_img * hw)
    for co in range(c_out):
        s = jnp.zeros((1, 1), jnp.float32)
        for n in range(n_img):
            r = n * c_out + co
            s = s + jnp.sum(o_ref[r:r + 1, :], axis=1, keepdims=True)
        mean = s * inv_cnt                                            # (1, 1)
        v = jnp.zeros((1, 1), jnp.float32)
        for n in range(n_img):
            r = n * c_out + co
            d = o_ref[r:r + 1, :] - mean
            v = v + jnp.sum(d * d, axis=1, keepdims=True)
        var = jnp.maximum(v * inv_cnt, 0.0)                           # (1, 1)
        scale = gamma_ref[co] * lax.rsqrt(var + BN_EPS)               # (1, 1)
        shift = beta_ref[co] - mean * scale                           # (1, 1)
        for n in range(n_img):
            r = n * c_out + co
            o_ref[r:r + 1, :] = o_ref[r:r + 1, :] * scale + shift


def dil_conv(x_nchw, params, *, kernel_size, stride, padding, dilation):
    """Pallas implementation of DilConv.forward.

    params = (dw, pw, gamma, beta) with
      dw: (C_in, K*K) depthwise taps, (kh, kw) row-major tap order
      pw: (C_in, C_out) 1x1 weights;  gamma/beta: (C_out,)
    """
    dw, pw, gamma, beta = params
    N, C, H, W = x_nchw.shape
    C_out = pw.shape[1]
    K = kernel_size
    # TODO(synk): stride=2 (DARTS reduction cells) and non-'same' padding need a
    # strided output index map; only the stride-1 'same' configs used by
    # dil_conv_3x3 / dil_conv_5x5 are wired up here.
    assert stride == 1
    assert 2 * padding == dilation * (K - 1), "kernel assumes 'same' spatial size"
    # TODO(synk): for v7x megacore, split over an N/Ho grid with a cross-core
    # stats reduction; at these shapes a single fused launch is faster.
    Ho, Wo = H, W
    HW = H * W

    marg = padding * (W + 1)                       # max |lane shift| of any tap
    marg_l = ((marg + 127) // 128) * 128           # keep the interior lane-aligned
    marg_r = marg

    # FREE, metadata-only relayout: contiguous NCHW -> (N*C, H*W) slabs.
    x_flat = x_nchw.reshape(N * C, HW).astype(jnp.float32)
    # Per-row tap weights (row n*C+c uses channel c's taps): 288 B of static
    # weight prep, not an activation-sized wrapper op.
    dwcol = jnp.tile(dw.astype(jnp.float32), (N, 1))                  # (N*C, K*K)

    # Per-tap in-image masks (== zero padding), trace-time constants.
    mask_np = np.zeros((K * K, HW), np.float32)
    for i in range(K):
        for j in range(K):
            di = i * dilation - padding
            dj = j * dilation - padding
            m = np.zeros((H, W), np.float32)
            m[max(0, -di):min(H, H - di), max(0, -dj):min(W, W - dj)] = 1.0
            mask_np[i * K + j] = m.reshape(-1)
    mask = jnp.asarray(mask_np)

    kernel = functools.partial(
        _dilconv_fused_kernel,
        n_img=N, c_in=C, c_out=C_out, height=H, width=W,
        ksize=K, dil=dilation, pad=padding, marg_l=marg_l, marg_r=marg_r)

    out_flat = pl.pallas_call(
        kernel,
        out_shape=jax.ShapeDtypeStruct((N * C_out, HW), jnp.float32),
        in_specs=[
            pl.BlockSpec(memory_space=pltpu.MemorySpace.VMEM),   # x slabs
            pl.BlockSpec(memory_space=pltpu.MemorySpace.VMEM),   # dwcol
            pl.BlockSpec(memory_space=pltpu.MemorySpace.VMEM),   # tap masks
            pl.BlockSpec(memory_space=pltpu.MemorySpace.SMEM),   # pw
            pl.BlockSpec(memory_space=pltpu.MemorySpace.SMEM),   # gamma
            pl.BlockSpec(memory_space=pltpu.MemorySpace.SMEM),   # beta
        ],
        out_specs=pl.BlockSpec(memory_space=pltpu.MemorySpace.VMEM),
        scratch_shapes=[
            pltpu.VMEM((N * C, marg_l + HW + marg_r), jnp.float32),
            pltpu.VMEM((N * C, HW), jnp.float32),
        ],
    )(x_flat, dwcol, mask, pw.astype(jnp.float32),
      gamma.astype(jnp.float32), beta.astype(jnp.float32))

    # FREE metadata reshape back to NCHW (no transpose).
    return out_flat.reshape(N, C_out, Ho, Wo)


def init_params(key, c_in, c_out, kernel_size):
    """Deterministic synthetic parameters (shapes follow the nn.Module __init__)."""
    k1, k2, k3, k4 = jax.random.split(key, 4)
    dw_t = 0.3 * jax.random.normal(k1, (c_in, 1, kernel_size, kernel_size), jnp.float32)
    pw_t = 0.3 * jax.random.normal(k2, (c_out, c_in, 1, 1), jnp.float32)
    gamma = 1.0 + 0.1 * jax.random.normal(k3, (c_out,), jnp.float32)
    beta = 0.1 * jax.random.normal(k4, (c_out,), jnp.float32)
    # torch layouts -> kernel layouts
    dw = dw_t.reshape(c_in, kernel_size * kernel_size)    # (C_in, K*K)
    pw = pw_t.reshape(c_out, c_in).T                      # (C_in, C_out)
    return dw, pw, gamma, beta


def reference(x_nchw, params, *, kernel_size, stride, padding, dilation):
    """Pure-JAX reference matching PyTorch semantics (training-mode BN)."""
    dw, pw, gamma, beta = params
    K = kernel_size
    x = x_nchw.astype(jnp.float32)
    C = x.shape[1]
    C_out = pw.shape[1]
    y = jnp.maximum(x, 0.0)
    dw_t = dw.reshape(C, 1, K, K)
    y = lax.conv_general_dilated(
        y, dw_t, window_strides=(stride, stride),
        padding=((padding, padding), (padding, padding)),
        rhs_dilation=(dilation, dilation), feature_group_count=C,
        dimension_numbers=('NCHW', 'OIHW', 'NCHW'),
        precision=lax.Precision.HIGHEST)
    pw_t = pw.T.reshape(C_out, C, 1, 1)
    y = lax.conv_general_dilated(
        y, pw_t, (1, 1), 'VALID',
        dimension_numbers=('NCHW', 'OIHW', 'NCHW'),
        precision=lax.Precision.HIGHEST)
    mean = jnp.mean(y, axis=(0, 2, 3), keepdims=True)
    var = jnp.mean(jnp.square(y - mean), axis=(0, 2, 3), keepdims=True)
    yhat = (y - mean) * lax.rsqrt(var + BN_EPS)
    return yhat * gamma.reshape(1, -1, 1, 1) + beta.reshape(1, -1, 1, 1)


if __name__ == "__main__":
    N, C, H, W = 2, 4, 16, 16
    C_out = 4
    kernel_size, stride, padding, dilation = 3, 1, 2, 2     # dil_conv_3x3 config

    key = jax.random.PRNGKey(0)
    kx, kp = jax.random.split(key)
    x = jax.random.normal(kx, (N, C, H, W), jnp.float32)
    params = init_params(kp, C, C_out, kernel_size)

    run = jax.jit(functools.partial(dil_conv, kernel_size=kernel_size,
                                    stride=stride, padding=padding,
                                    dilation=dilation))
    out = jax.block_until_ready(run(x, params))

    ref = reference(x, params, kernel_size=kernel_size, stride=stride,
                    padding=padding, dilation=dilation)
    assert out.shape == ref.shape == (N, C_out, H, W)
    assert jnp.allclose(out, ref, atol=1e-3, rtol=1e-3)
    print("KERNEL_OK")
</pallas_src>

<mosaic_0001>
module attributes {stable_mosaic.version = 11 : i64} {
  func.func @_dilconv_fused_kernel(%arg0: memref<8x256xf32, #tpu.memory_space<vmem>>, %arg1: memref<8x9xf32, #tpu.memory_space<vmem>>, %arg2: memref<9x256xf32, #tpu.memory_space<vmem>>, %arg3: memref<4x4xf32, #tpu.memory_space<smem>>, %arg4: memref<4xf32, #tpu.memory_space<smem>>, %arg5: memref<4xf32, #tpu.memory_space<smem>>, %arg6: memref<8x256xf32, #tpu.memory_space<vmem>>, %arg7: memref<8x418xf32, #tpu.memory_space<vmem>>, %arg8: memref<8x256xf32, #tpu.memory_space<vmem>>) attributes {dimension_semantics = [], scalar_prefetch = 0 : i64, scratch_operands = 2 : i64, tpu.core_type = #tpu.core_type<tc>} {
    %cst = arith.constant 0.000000e+00 : f32
    %0 = vector.broadcast %cst : f32 to vector<8x128xf32>
    %c0 = arith.constant 0 : index
    %c0_0 = arith.constant 0 : index
    %1 = vector.load %arg7[%c0, %c0_0] : memref<8x418xf32, #tpu.memory_space<vmem>>, vector<8x128xf32>
    tpu.vector_store %arg7[%c0, %c0_0], %0 {strides = array<i32>} : memref<8x418xf32, #tpu.memory_space<vmem>>, vector<8x128xf32>,
    %cst_1 = arith.constant 0.000000e+00 : f32
    %2 = vector.broadcast %cst_1 : f32 to vector<8x34xf32>
    %c0_2 = arith.constant 0 : index
    %c384 = arith.constant 384 : index
    %3 = vector.load %arg7[%c0_2, %c384] : memref<8x418xf32, #tpu.memory_space<vmem>>, vector<8x34xf32>
    tpu.vector_store %arg7[%c0_2, %c384], %2 {strides = array<i32>} : memref<8x418xf32, #tpu.memory_space<vmem>>, vector<8x34xf32>,
    %c0_3 = arith.constant 0 : index
    %c0_4 = arith.constant 0 : index
    %4 = vector.load %arg0[%c0_3, %c0_4] : memref<8x256xf32, #tpu.memory_space<vmem>>, vector<8x256xf32>
    %cst_5 = arith.constant 0.000000e+00 : f32
    %5 = vector.broadcast %cst_5 : f32 to vector<8x256xf32>
    %6 = arith.maximumf %4, %5 : vector<8x256xf32>
    %c0_6 = arith.constant 0 : index
    %c128 = arith.constant 128 : index
    %7 = vector.load %arg7[%c0_6, %c128] : memref<8x418xf32, #tpu.memory_space<vmem>>, vector<8x256xf32>
    tpu.vector_store %arg7[%c0_6, %c128], %6 {strides = array<i32>} : memref<8x418xf32, #tpu.memory_space<vmem>>, vector<8x256xf32>,
    %cst_7 = arith.constant 0.000000e+00 : f32
    %8 = vector.broadcast %cst_7 : f32 to vector<8x256xf32>
    %c0_8 = arith.constant 0 : index
    %c94 = arith.constant 94 : index
    %9 = vector.load %arg7[%c0_8, %c94] : memref<8x418xf32, #tpu.memory_space<vmem>>, vector<8x256xf32>
    %c0_9 = arith.constant 0 : index
    %c0_10 = arith.constant 0 : index
    %10 = vector.load %arg1[%c0_9, %c0_10] : memref<8x9xf32, #tpu.memory_space<vmem>>, vector<8x1xf32>
    %c0_11 = arith.constant 0 : index
    %c0_12 = arith.constant 0 : index
    %11 = vector.load %arg2[%c0_11, %c0_12] : memref<9x256xf32, #tpu.memory_space<vmem>>, vector<1x256xf32>
    %12 = vector.broadcast %10 : vector<8x1xf32> to vector<8x256xf32>
    %13 = arith.mulf %9, %12 : vector<8x256xf32>
    %14 = vector.broadcast %11 : vector<1x256xf32> to vector<8x256xf32>
    %15 = arith.mulf %13, %14 : vector<8x256xf32>
    %16 = arith.addf %8, %15 : vector<8x256xf32>
    %c0_13 = arith.constant 0 : index
    %c96 = arith.constant 96 : index
    %17 = vector.load %arg7[%c0_13, %c96] : memref<8x418xf32, #tpu.memory_space<vmem>>, vector<8x256xf32>
    %c0_14 = arith.constant 0 : index
    %c1 = arith.constant 1 : index
    %18 = vector.load %arg1[%c0_14, %c1] : memref<8x9xf32, #tpu.memory_space<vmem>>, vector<8x1xf32>
    %c1_15 = arith.constant 1 : index
    %c0_16 = arith.constant 0 : index
    %19 = vector.load %arg2[%c1_15, %c0_16] : memref<9x256xf32, #tpu.memory_space<vmem>>, vector<1x256xf32>
    %20 = vector.broadcast %18 : vector<8x1xf32> to vector<8x256xf32>
    %21 = arith.mulf %17, %20 : vector<8x256xf32>
    %22 = vector.broadcast %19 : vector<1x256xf32> to vector<8x256xf32>
    %23 = arith.mulf %21, %22 : vector<8x256xf32>
    %24 = arith.addf %16, %23 : vector<8x256xf32>
    %c0_17 = arith.constant 0 : index
    %c98 = arith.constant 98 : index
    %25 = vector.load %arg7[%c0_17, %c98] : memref<8x418xf32, #tpu.memory_space<vmem>>, vector<8x256xf32>
    %c0_18 = arith.constant 0 : index
    %c2 = arith.constant 2 : index
    %26 = vector.load %arg1[%c0_18, %c2] : memref<8x9xf32, #tpu.memory_space<vmem>>, vector<8x1xf32>
    %c2_19 = arith.constant 2 : index
    %c0_20 = arith.constant 0 : index
    %27 = vector.load %arg2[%c2_19, %c0_20] : memref<9x256xf32, #tpu.memory_space<vmem>>, vector<1x256xf32>
    %28 = vector.broadcast %26 : vector<8x1xf32> to vector<8x256xf32>
    %29 = arith.mulf %25, %28 : vector<8x256xf32>
    %30 = vector.broadcast %27 : vector<1x256xf32> to vector<8x256xf32>
    %31 = arith.mulf %29, %30 : vector<8x256xf32>
    %32 = arith.addf %24, %31 : vector<8x256xf32>
    %c0_21 = arith.constant 0 : index
    %c126 = arith.constant 126 : index
    %33 = vector.load %arg7[%c0_21, %c126] : memref<8x418xf32, #tpu.memory_space<vmem>>, vector<8x256xf32>
    %c0_22 = arith.constant 0 : index
    %c3 = arith.constant 3 : index
    %34 = vector.load %arg1[%c0_22, %c3] : memref<8x9xf32, #tpu.memory_space<vmem>>, vector<8x1xf32>
    %c3_23 = arith.constant 3 : index
    %c0_24 = arith.constant 0 : index
    %35 = vector.load %arg2[%c3_23, %c0_24] : memref<9x256xf32, #tpu.memory_space<vmem>>, vector<1x256xf32>
    %36 = vector.broadcast %34 : vector<8x1xf32> to vector<8x256xf32>
    %37 = arith.mulf %33, %36 : vector<8x256xf32>
    %38 = vector.broadcast %35 : vector<1x256xf32> to vector<8x256xf32>
    %39 = arith.mulf %37, %38 : vector<8x256xf32>
    %40 = arith.addf %32, %39 : vector<8x256xf32>
    %c0_25 = arith.constant 0 : index
    %c128_26 = arith.constant 128 : index
    %41 = vector.load %arg7[%c0_25, %c128_26] : memref<8x418xf32, #tpu.memory_space<vmem>>, vector<8x256xf32>
    %c0_27 = arith.constant 0 : index
    %c4 = arith.constant 4 : index
    %42 = vector.load %arg1[%c0_27, %c4] : memref<8x9xf32, #tpu.memory_space<vmem>>, vector<8x1xf32>
    %c4_28 = arith.constant 4 : index
    %c0_29 = arith.constant 0 : index
    %43 = vector.load %arg2[%c4_28, %c0_29] : memref<9x256xf32, #tpu.memory_space<vmem>>, vector<1x256xf32>
    %44 = vector.broadcast %42 : vector<8x1xf32> to vector<8x256xf32>
    %45 = arith.mulf %41, %44 : vector<8x256xf32>
    %46 = vector.broadcast %43 : vector<1x256xf32> to vector<8x256xf32>
    %47 = arith.mulf %45, %46 : vector<8x256xf32>
    %48 = arith.addf %40, %47 : vector<8x256xf32>
    %c0_30 = arith.constant 0 : index
    %c130 = arith.constant 130 : index
    %49 = vector.load %arg7[%c0_30, %c130] : memref<8x418xf32, #tpu.memory_space<vmem>>, vector<8x256xf32>
    %c0_31 = arith.constant 0 : index
    %c5 = arith.constant 5 : index
    %50 = vector.load %arg1[%c0_31, %c5] : memref<8x9xf32, #tpu.memory_space<vmem>>, vector<8x1xf32>
    %c5_32 = arith.constant 5 : index
    %c0_33 = arith.constant 0 : index
    %51 = vector.load %arg2[%c5_32, %c0_33] : memref<9x256xf32, #tpu.memory_space<vmem>>, vector<1x256xf32>
    %52 = vector.broadcast %50 : vector<8x1xf32> to vector<8x256xf32>
    %53 = arith.mulf %49, %52 : vector<8x256xf32>
    %54 = vector.broadcast %51 : vector<1x256xf32> to vector<8x256xf32>
    %55 = arith.mulf %53, %54 : vector<8x256xf32>
    %56 = arith.addf %48, %55 : vector<8x256xf32>
    %c0_34 = arith.constant 0 : index
    %c158 = arith.constant 158 : index
    %57 = vector.load %arg7[%c0_34, %c158] : memref<8x418xf32, #tpu.memory_space<vmem>>, vector<8x256xf32>
    %c0_35 = arith.constant 0 : index
    %c6 = arith.constant 6 : index
    %58 = vector.load %arg1[%c0_35, %c6] : memref<8x9xf32, #tpu.memory_space<vmem>>, vector<8x1xf32>
    %c6_36 = arith.constant 6 : index
    %c0_37 = arith.constant 0 : index
    %59 = vector.load %arg2[%c6_36, %c0_37] : memref<9x256xf32, #tpu.memory_space<vmem>>, vector<1x256xf32>
    %60 = vector.broadcast %58 : vector<8x1xf32> to vector<8x256xf32>
    %61 = arith.mulf %57, %60 : vector<8x256xf32>
    %62 = vector.broadcast %59 : vector<1x256xf32> to vector<8x256xf32>
    %63 = arith.mulf %61, %62 : vector<8x256xf32>
    %64 = arith.addf %56, %63 : vector<8x256xf32>
    %c0_38 = arith.constant 0 : index
    %c160 = arith.constant 160 : index
    %65 = vector.load %arg7[%c0_38, %c160] : memref<8x418xf32, #tpu.memory_space<vmem>>, vector<8x256xf32>
    %c0_39 = arith.constant 0 : index
    %c7 = arith.constant 7 : index
    %66 = vector.load %arg1[%c0_39, %c7] : memref<8x9xf32, #tpu.memory_space<vmem>>, vector<8x1xf32>
    %c7_40 = arith.constant 7 : index
    %c0_41 = arith.constant 0 : index
    %67 = vector.load %arg2[%c7_40, %c0_41] : memref<9x256xf32, #tpu.memory_space<vmem>>, vector<1x256xf32>
    %68 = vector.broadcast %66 : vector<8x1xf32> to vector<8x256xf32>
    %69 = arith.mulf %65, %68 : vector<8x256xf32>
    %70 = vector.broadcast %67 : vector<1x256xf32> to vector<8x256xf32>
    %71 = arith.mulf %69, %70 : vector<8x256xf32>
    %72 = arith.addf %64, %71 : vector<8x256xf32>
    %c0_42 = arith.constant 0 : index
    %c162 = arith.constant 162 : index
    %73 = vector.load %arg7[%c0_42, %c162] : memref<8x418xf32, #tpu.memory_space<vmem>>, vector<8x256xf32>
    %c0_43 = arith.constant 0 : index
    %c8 = arith.constant 8 : index
    %74 = vector.load %arg1[%c0_43, %c8] : memref<8x9xf32, #tpu.memory_space<vmem>>, vector<8x1xf32>
    %c8_44 = arith.constant 8 : index
    %c0_45 = arith.constant 0 : index
    %75 = vector.load %arg2[%c8_44, %c0_45] : memref<9x256xf32, #tpu.memory_space<vmem>>, vector<1x256xf32>
    %76 = vector.broadcast %74 : vector<8x1xf32> to vector<8x256xf32>
    %77 = arith.mulf %73, %76 : vector<8x256xf32>
    %78 = vector.broadcast %75 : vector<1x256xf32> to vector<8x256xf32>
    %79 = arith.mulf %77, %78 : vector<8x256xf32>
    %80 = arith.addf %72, %79 : vector<8x256xf32>
    %c0_46 = arith.constant 0 : index
    %c0_47 = arith.constant 0 : index
    %81 = vector.load %arg8[%c0_46, %c0_47] : memref<8x256xf32, #tpu.memory_space<vmem>>, vector<8x256xf32>
    tpu.vector_store %arg8[%c0_46, %c0_47], %80 {strides = array<i32>} : memref<8x256xf32, #tpu.memory_space<vmem>>, vector<8x256xf32>,
    %c0_48 = arith.constant 0 : index
    %c0_49 = arith.constant 0 : index
    %82 = vector.load %arg8[%c0_48, %c0_49] : memref<8x256xf32, #tpu.memory_space<vmem>>, vector<1x256xf32>
    %c1_50 = arith.constant 1 : index
    %c0_51 = arith.constant 0 : index
    %83 = vector.load %arg8[%c1_50, %c0_51] : memref<8x256xf32, #tpu.memory_space<vmem>>, vector<1x256xf32>
    %c2_52 = arith.constant 2 : index
    %c0_53 = arith.constant 0 : index
    %84 = vector.load %arg8[%c2_52, %c0_53] : memref<8x256xf32, #tpu.memory_space<vmem>>, vector<1x256xf32>
    %c3_54 = arith.constant 3 : index
    %c0_55 = arith.constant 0 : index
    %85 = vector.load %arg8[%c3_54, %c0_55] : memref<8x256xf32, #tpu.memory_space<vmem>>, vector<1x256xf32>
    %c0_56 = arith.constant 0 : index
    %c0_57 = arith.constant 0 : index
    %86 = memref.load %arg3[%c0_56, %c0_57] : memref<4x4xf32, #tpu.memory_space<smem>>
    %87 = vector.broadcast %86 : f32 to vector<1x256xf32>
    %88 = arith.mulf %82, %87 : vector<1x256xf32>
    %c1_58 = arith.constant 1 : index
    %c0_59 = arith.constant 0 : index
    %89 = memref.load %arg3[%c1_58, %c0_59] : memref<4x4xf32, #tpu.memory_space<smem>>
    %90 = vector.broadcast %89 : f32 to vector<1x256xf32>
    %91 = arith.mulf %83, %90 : vector<1x256xf32>
    %92 = arith.addf %88, %91 : vector<1x256xf32>
    %c2_60 = arith.constant 2 : index
    %c0_61 = arith.constant 0 : index
    %93 = memref.load %arg3[%c2_60, %c0_61] : memref<4x4xf32, #tpu.memory_space<smem>>
    %94 = vector.broadcast %93 : f32 to vector<1x256xf32>
    %95 = arith.mulf %84, %94 : vector<1x256xf32>
    %96 = arith.addf %92, %95 : vector<1x256xf32>
    %c3_62 = arith.constant 3 : index
    %c0_63 = arith.constant 0 : index
    %97 = memref.load %arg3[%c3_62, %c0_63] : memref<4x4xf32, #tpu.memory_space<smem>>
    %98 = vector.broadcast %97 : f32 to vector<1x256xf32>
    %99 = arith.mulf %85, %98 : vector<1x256xf32>
    %100 = arith.addf %96, %99 : vector<1x256xf32>
    %c0_64 = arith.constant 0 : index
    %c0_65 = arith.constant 0 : index
    %101 = vector.load %arg6[%c0_64, %c0_65] : memref<8x256xf32, #tpu.memory_space<vmem>>, vector<1x256xf32>
    tpu.vector_store %arg6[%c0_64, %c0_65], %100 {strides = array<i32>} : memref<8x256xf32, #tpu.memory_space<vmem>>, vector<1x256xf32>,
    %c0_66 = arith.constant 0 : index
    %c1_67 = arith.constant 1 : index
    %102 = memref.load %arg3[%c0_66, %c1_67] : memref<4x4xf32, #tpu.memory_space<smem>>
    %103 = vector.broadcast %102 : f32 to vector<1x256xf32>
    %104 = arith.mulf %82, %103 : vector<1x256xf32>
    %c1_68 = arith.constant 1 : index
    %c1_69 = arith.constant 1 : index
    %105 = memref.load %arg3[%c1_68, %c1_69] : memref<4x4xf32, #tpu.memory_space<smem>>
    %106 = vector.broadcast %105 : f32 to vector<1x256xf32>
    %107 = arith.mulf %83, %106 : vector<1x256xf32>
    %108 = arith.addf %104, %107 : vector<1x256xf32>
    %c2_70 = arith.constant 2 : index
    %c1_71 = arith.constant 1 : index
    %109 = memref.load %arg3[%c2_70, %c1_71] : memref<4x4xf32, #tpu.memory_space<smem>>
    %110 = vector.broadcast %109 : f32 to vector<1x256xf32>
    %111 = arith.mulf %84, %110 : vector<1x256xf32>
    %112 = arith.addf %108, %111 : vector<1x256xf32>
    %c3_72 = arith.constant 3 : index
    %c1_73 = arith.constant 1 : index
    %113 = memref.load %arg3[%c3_72, %c1_73] : memref<4x4xf32, #tpu.memory_space<smem>>
    %114 = vector.broadcast %113 : f32 to vector<1x256xf32>
    %115 = arith.mulf %85, %114 : vector<1x256xf32>
    %116 = arith.addf %112, %115 : vector<1x256xf32>
    %c1_74 = arith.constant 1 : index
    %c0_75 = arith.constant 0 : index
    %117 = vector.load %arg6[%c1_74, %c0_75] : memref<8x256xf32, #tpu.memory_space<vmem>>, vector<1x256xf32>
    tpu.vector_store %arg6[%c1_74, %c0_75], %116 {strides = array<i32>} : memref<8x256xf32, #tpu.memory_space<vmem>>, vector<1x256xf32>,
    %c0_76 = arith.constant 0 : index
    %c2_77 = arith.constant 2 : index
    %118 = memref.load %arg3[%c0_76, %c2_77] : memref<4x4xf32, #tpu.memory_space<smem>>
    %119 = vector.broadcast %118 : f32 to vector<1x256xf32>
    %120 = arith.mulf %82, %119 : vector<1x256xf32>
    %c1_78 = arith.constant 1 : index
    %c2_79 = arith.constant 2 : index
    %121 = memref.load %arg3[%c1_78, %c2_79] : memref<4x4xf32, #tpu.memory_space<smem>>
    %122 = vector.broadcast %121 : f32 to vector<1x256xf32>
    %123 = arith.mulf %83, %122 : vector<1x256xf32>
    %124 = arith.addf %120, %123 : vector<1x256xf32>
    %c2_80 = arith.constant 2 : index
    %c2_81 = arith.constant 2 : index
    %125 = memref.load %arg3[%c2_80, %c2_81] : memref<4x4xf32, #tpu.memory_space<smem>>
    %126 = vector.broadcast %125 : f32 to vector<1x256xf32>
    %127 = arith.mulf %84, %126 : vector<1x256xf32>
    %128 = arith.addf %124, %127 : vector<1x256xf32>
    %c3_82 = arith.constant 3 : index
    %c2_83 = arith.constant 2 : index
    %129 = memref.load %arg3[%c3_82, %c2_83] : memref<4x4xf32, #tpu.memory_space<smem>>
    %130 = vector.broadcast %129 : f32 to vector<1x256xf32>
    %131 = arith.mulf %85, %130 : vector<1x256xf32>
    %132 = arith.addf %128, %131 : vector<1x256xf32>
    %c2_84 = arith.constant 2 : index
    %c0_85 = arith.constant 0 : index
    %133 = vector.load %arg6[%c2_84, %c0_85] : memref<8x256xf32, #tpu.memory_space<vmem>>, vector<1x256xf32>
    tpu.vector_store %arg6[%c2_84, %c0_85], %132 {strides = array<i32>} : memref<8x256xf32, #tpu.memory_space<vmem>>, vector<1x256xf32>,
    %c0_86 = arith.constant 0 : index
    %c3_87 = arith.constant 3 : index
    %134 = memref.load %arg3[%c0_86, %c3_87] : memref<4x4xf32, #tpu.memory_space<smem>>
    %135 = vector.broadcast %134 : f32 to vector<1x256xf32>
    %136 = arith.mulf %82, %135 : vector<1x256xf32>
    %c1_88 = arith.constant 1 : index
    %c3_89 = arith.constant 3 : index
    %137 = memref.load %arg3[%c1_88, %c3_89] : memref<4x4xf32, #tpu.memory_space<smem>>
    %138 = vector.broadcast %137 : f32 to vector<1x256xf32>
    %139 = arith.mulf %83, %138 : vector<1x256xf32>
    %140 = arith.addf %136, %139 : vector<1x256xf32>
    %c2_90 = arith.constant 2 : index
    %c3_91 = arith.constant 3 : index
    %141 = memref.load %arg3[%c2_90, %c3_91] : memref<4x4xf32, #tpu.memory_space<smem>>
    %142 = vector.broadcast %141 : f32 to vector<1x256xf32>
    %143 = arith.mulf %84, %142 : vector<1x256xf32>
    %144 = arith.addf %140, %143 : vector<1x256xf32>
    %c3_92 = arith.constant 3 : index
    %c3_93 = arith.constant 3 : index
    %145 = memref.load %arg3[%c3_92, %c3_93] : memref<4x4xf32, #tpu.memory_space<smem>>
    %146 = vector.broadcast %145 : f32 to vector<1x256xf32>
    %147 = arith.mulf %85, %146 : vector<1x256xf32>
    %148 = arith.addf %144, %147 : vector<1x256xf32>
    %c3_94 = arith.constant 3 : index
    %c0_95 = arith.constant 0 : index
    %149 = vector.load %arg6[%c3_94, %c0_95] : memref<8x256xf32, #tpu.memory_space<vmem>>, vector<1x256xf32>
    tpu.vector_store %arg6[%c3_94, %c0_95], %148 {strides = array<i32>} : memref<8x256xf32, #tpu.memory_space<vmem>>, vector<1x256xf32>,
    %c4_96 = arith.constant 4 : index
    %c0_97 = arith.constant 0 : index
    %150 = vector.load %arg8[%c4_96, %c0_97] : memref<8x256xf32, #tpu.memory_space<vmem>>, vector<1x256xf32>
    %c5_98 = arith.constant 5 : index
    %c0_99 = arith.constant 0 : index
    %151 = vector.load %arg8[%c5_98, %c0_99] : memref<8x256xf32, #tpu.memory_space<vmem>>, vector<1x256xf32>
    %c6_100 = arith.constant 6 : index
    %c0_101 = arith.constant 0 : index
    %152 = vector.load %arg8[%c6_100, %c0_101] : memref<8x256xf32, #tpu.memory_space<vmem>>, vector<1x256xf32>
    %c7_102 = arith.constant 7 : index
    %c0_103 = arith.constant 0 : index
    %153 = vector.load %arg8[%c7_102, %c0_103] : memref<8x256xf32, #tpu.memory_space<vmem>>, vector<1x256xf32>
    %c0_104 = arith.constant 0 : index
    %c0_105 = arith.constant 0 : index
    %154 = memref.load %arg3[%c0_104, %c0_105] : memref<4x4xf32, #tpu.memory_space<smem>>
    %155 = vector.broadcast %154 : f32 to vector<1x256xf32>
    %156 = arith.mulf %150, %155 : vector<1x256xf32>
    %c1_106 = arith.constant 1 : index
    %c0_107 = arith.constant 0 : index
    %157 = memref.load %arg3[%c1_106, %c0_107] : memref<4x4xf32, #tpu.memory_space<smem>>
    %158 = vector.broadcast %157 : f32 to vector<1x256xf32>
    %159 = arith.mulf %151, %158 : vector<1x256xf32>
    %160 = arith.addf %156, %159 : vector<1x256xf32>
    %c2_108 = arith.constant 2 : index
    %c0_109 = arith.constant 0 : index
    %161 = memref.load %arg3[%c2_108, %c0_109] : memref<4x4xf32, #tpu.memory_space<smem>>
    %162 = vector.broadcast %161 : f32 to vector<1x256xf32>
    %163 = arith.mulf %152, %162 : vector<1x256xf32>
    %164 = arith.addf %160, %163 : vector<1x256xf32>
    %c3_110 = arith.constant 3 : index
    %c0_111 = arith.constant 0 : index
    %165 = memref.load %arg3[%c3_110, %c0_111] : memref<4x4xf32, #tpu.memory_space<smem>>
    %166 = vector.broadcast %165 : f32 to vector<1x256xf32>
    %167 = arith.mulf %153, %166 : vector<1x256xf32>
    %168 = arith.addf %164, %167 : vector<1x256xf32>
    %c4_112 = arith.constant 4 : index
    %c0_113 = arith.constant 0 : index
    %169 = vector.load %arg6[%c4_112, %c0_113] : memref<8x256xf32, #tpu.memory_space<vmem>>, vector<1x256xf32>
    tpu.vector_store %arg6[%c4_112, %c0_113], %168 {strides = array<i32>} : memref<8x256xf32, #tpu.memory_space<vmem>>, vector<1x256xf32>,
    %c0_114 = arith.constant 0 : index
    %c1_115 = arith.constant 1 : index
    %170 = memref.load %arg3[%c0_114, %c1_115] : memref<4x4xf32, #tpu.memory_space<smem>>
    %171 = vector.broadcast %170 : f32 to vector<1x256xf32>
    %172 = arith.mulf %150, %171 : vector<1x256xf32>
    %c1_116 = arith.constant 1 : index
    %c1_117 = arith.constant 1 : index
    %173 = memref.load %arg3[%c1_116, %c1_117] : memref<4x4xf32, #tpu.memory_space<smem>>
    %174 = vector.broadcast %173 : f32 to vector<1x256xf32>
    %175 = arith.mulf %151, %174 : vector<1x256xf32>
    %176 = arith.addf %172, %175 : vector<1x256xf32>
    %c2_118 = arith.constant 2 : index
    %c1_119 = arith.constant 1 : index
    %177 = memref.load %arg3[%c2_118, %c1_119] : memref<4x4xf32, #tpu.memory_space<smem>>
    %178 = vector.broadcast %177 : f32 to vector<1x256xf32>
    %179 = arith.mulf %152, %178 : vector<1x256xf32>
    %180 = arith.addf %176, %179 : vector<1x256xf32>
    %c3_120 = arith.constant 3 : index
    %c1_121 = arith.constant 1 : index
    %181 = memref.load %arg3[%c3_120, %c1_121] : memref<4x4xf32, #tpu.memory_space<smem>>
    %182 = vector.broadcast %181 : f32 to vector<1x256xf32>
    %183 = arith.mulf %153, %182 : vector<1x256xf32>
    %184 = arith.addf %180, %183 : vector<1x256xf32>
    %c5_122 = arith.constant 5 : index
    %c0_123 = arith.constant 0 : index
    %185 = vector.load %arg6[%c5_122, %c0_123] : memref<8x256xf32, #tpu.memory_space<vmem>>, vector<1x256xf32>
    tpu.vector_store %arg6[%c5_122, %c0_123], %184 {strides = array<i32>} : memref<8x256xf32, #tpu.memory_space<vmem>>, vector<1x256xf32>,
    %c0_124 = arith.constant 0 : index
    %c2_125 = arith.constant 2 : index
    %186 = memref.load %arg3[%c0_124, %c2_125] : memref<4x4xf32, #tpu.memory_space<smem>>
    %187 = vector.broadcast %186 : f32 to vector<1x256xf32>
    %188 = arith.mulf %150, %187 : vector<1x256xf32>
    %c1_126 = arith.constant 1 : index
    %c2_127 = arith.constant 2 : index
    %189 = memref.load %arg3[%c1_126, %c2_127] : memref<4x4xf32, #tpu.memory_space<smem>>
    %190 = vector.broadcast %189 : f32 to vector<1x256xf32>
    %191 = arith.mulf %151, %190 : vector<1x256xf32>
    %192 = arith.addf %188, %191 : vector<1x256xf32>
    %c2_128 = arith.constant 2 : index
    %c2_129 = arith.constant 2 : index
    %193 = memref.load %arg3[%c2_128, %c2_129] : memref<4x4xf32, #tpu.memory_space<smem>>
    %194 = vector.broadcast %193 : f32 to vector<1x256xf32>
    %195 = arith.mulf %152, %194 : vector<1x256xf32>
    %196 = arith.addf %192, %195 : vector<1x256xf32>
    %c3_130 = arith.constant 3 : index
    %c2_131 = arith.constant 2 : index
    %197 = memref.load %arg3[%c3_130, %c2_131] : memref<4x4xf32, #tpu.memory_space<smem>>
    %198 = vector.broadcast %197 : f32 to vector<1x256xf32>
    %199 = arith.mulf %153, %198 : vector<1x256xf32>
    %200 = arith.addf %196, %199 : vector<1x256xf32>
    %c6_132 = arith.constant 6 : index
    %c0_133 = arith.constant 0 : index
    %201 = vector.load %arg6[%c6_132, %c0_133] : memref<8x256xf32, #tpu.memory_space<vmem>>, vector<1x256xf32>
    tpu.vector_store %arg6[%c6_132, %c0_133], %200 {strides = array<i32>} : memref<8x256xf32, #tpu.memory_space<vmem>>, vector<1x256xf32>,
    %c0_134 = arith.constant 0 : index
    %c3_135 = arith.constant 3 : index
    %202 = memref.load %arg3[%c0_134, %c3_135] : memref<4x4xf32, #tpu.memory_space<smem>>
    %203 = vector.broadcast %202 : f32 to vector<1x256xf32>
    %204 = arith.mulf %150, %203 : vector<1x256xf32>
    %c1_136 = arith.constant 1 : index
    %c3_137 = arith.constant 3 : index
    %205 = memref.load %arg3[%c1_136, %c3_137] : memref<4x4xf32, #tpu.memory_space<smem>>
    %206 = vector.broadcast %205 : f32 to vector<1x256xf32>
    %207 = arith.mulf %151, %206 : vector<1x256xf32>
    %208 = arith.addf %204, %207 : vector<1x256xf32>
    %c2_138 = arith.constant 2 : index
    %c3_139 = arith.constant 3 : index
    %209 = memref.load %arg3[%c2_138, %c3_139] : memref<4x4xf32, #tpu.memory_space<smem>>
    %210 = vector.broadcast %209 : f32 to vector<1x256xf32>
    %211 = arith.mulf %152, %210 : vector<1x256xf32>
    %212 = arith.addf %208, %211 : vector<1x256xf32>
    %c3_140 = arith.constant 3 : index
    %c3_141 = arith.constant 3 : index
    %213 = memref.load %arg3[%c3_140, %c3_141] : memref<4x4xf32, #tpu.memory_space<smem>>
    %214 = vector.broadcast %213 : f32 to vector<1x256xf32>
    %215 = arith.mulf %153, %214 : vector<1x256xf32>
    %216 = arith.addf %212, %215 : vector<1x256xf32>
    %c7_142 = arith.constant 7 : index
    %c0_143 = arith.constant 0 : index
    %217 = vector.load %arg6[%c7_142, %c0_143] : memref<8x256xf32, #tpu.memory_space<vmem>>, vector<1x256xf32>
    tpu.vector_store %arg6[%c7_142, %c0_143], %216 {strides = array<i32>} : memref<8x256xf32, #tpu.memory_space<vmem>>, vector<1x256xf32>,
    %cst_144 = arith.constant 0.000000e+00 : f32
    %218 = vector.broadcast %cst_144 : f32 to vector<1x1xf32>
    %c0_145 = arith.constant 0 : index
    %c0_146 = arith.constant 0 : index
    %219 = vector.load %arg6[%c0_145, %c0_146] : memref<8x256xf32, #tpu.memory_space<vmem>>, vector<1x256xf32>
    %cst_147 = arith.constant dense<0.000000e+00> : vector<1xf32>
    %220 = vector.multi_reduction <add>, %219, %cst_147 [1] : vector<1x256xf32> to vector<1xf32>
    %221 = vector.shape_cast %220 : vector<1xf32> to vector<1x1xf32>
    %222 = arith.addf %218, %221 : vector<1x1xf32>
    %c4_148 = arith.constant 4 : index
    %c0_149 = arith.constant 0 : index
    %223 = vector.load %arg6[%c4_148, %c0_149] : memref<8x256xf32, #tpu.memory_space<vmem>>, vector<1x256xf32>
    %cst_150 = arith.constant dense<0.000000e+00> : vector<1xf32>
    %224 = vector.multi_reduction <add>, %223, %cst_150 [1] : vector<1x256xf32> to vector<1xf32>
    %225 = vector.shape_cast %224 : vector<1xf32> to vector<1x1xf32>
    %226 = arith.addf %222, %225 : vector<1x1xf32>
    %cst_151 = arith.constant 0.001953125 : f32
    %227 = vector.broadcast %cst_151 : f32 to vector<1x1xf32>
    %228 = arith.mulf %226, %227 : vector<1x1xf32>
    %cst_152 = arith.constant 0.000000e+00 : f32
    %229 = vector.broadcast %cst_152 : f32 to vector<1x1xf32>
    %c0_153 = arith.constant 0 : index
    %c0_154 = arith.constant 0 : index
    %230 = vector.load %arg6[%c0_153, %c0_154] : memref<8x256xf32, #tpu.memory_space<vmem>>, vector<1x256xf32>
    %231 = vector.broadcast %228 : vector<1x1xf32> to vector<1x256xf32>
    %232 = arith.subf %230, %231 : vector<1x256xf32>
    %233 = arith.mulf %232, %232 : vector<1x256xf32>
    %cst_155 = arith.constant dense<0.000000e+00> : vector<1xf32>
    %234 = vector.multi_reduction <add>, %233, %cst_155 [1] : vector<1x256xf32> to vector<1xf32>
    %235 = vector.shape_cast %234 : vector<1xf32> to vector<1x1xf32>
    %236 = arith.addf %229, %235 : vector<1x1xf32>
    %c4_156 = arith.constant 4 : index
    %c0_157 = arith.constant 0 : index
    %237 = vector.load %arg6[%c4_156, %c0_157] : memref<8x256xf32, #tpu.memory_space<vmem>>, vector<1x256xf32>
    %238 = vector.broadcast %228 : vector<1x1xf32> to vector<1x256xf32>
    %239 = arith.subf %237, %238 : vector<1x256xf32>
    %240 = arith.mulf %239, %239 : vector<1x256xf32>
    %cst_158 = arith.constant dense<0.000000e+00> : vector<1xf32>
    %241 = vector.multi_reduction <add>, %240, %cst_158 [1] : vector<1x256xf32> to vector<1xf32>
    %242 = vector.shape_cast %241 : vector<1xf32> to vector<1x1xf32>
    %243 = arith.addf %236, %242 : vector<1x1xf32>
    %cst_159 = arith.constant 0.001953125 : f32
    %244 = vector.broadcast %cst_159 : f32 to vector<1x1xf32>
    %245 = arith.mulf %243, %244 : vector<1x1xf32>
    %cst_160 = arith.constant 0.000000e+00 : f32
    %246 = vector.broadcast %cst_160 : f32 to vector<1x1xf32>
    %247 = arith.maximumf %245, %246 : vector<1x1xf32>
    %c0_161 = arith.constant 0 : index
    %248 = memref.load %arg4[%c0_161] : memref<4xf32, #tpu.memory_space<smem>>
    %cst_162 = arith.constant 9.99999974E-6 : f32
    %249 = vector.broadcast %cst_162 : f32 to vector<1x1xf32>
    %250 = arith.addf %247, %249 : vector<1x1xf32>
    %251 = math.rsqrt %250 : vector<1x1xf32>
    %252 = vector.broadcast %248 : f32 to vector<1x1xf32>
    %253 = arith.mulf %252, %251 : vector<1x1xf32>
    %c0_163 = arith.constant 0 : index
    %254 = memref.load %arg5[%c0_163] : memref<4xf32, #tpu.memory_space<smem>>
    %255 = arith.mulf %228, %253 : vector<1x1xf32>
    %256 = vector.broadcast %254 : f32 to vector<1x1xf32>
    %257 = arith.subf %256, %255 : vector<1x1xf32>
    %c0_164 = arith.constant 0 : index
    %c0_165 = arith.constant 0 : index
    %258 = vector.load %arg6[%c0_164, %c0_165] : memref<8x256xf32, #tpu.memory_space<vmem>>, vector<1x256xf32>
    %259 = vector.broadcast %253 : vector<1x1xf32> to vector<1x256xf32>
    %260 = arith.mulf %258, %259 : vector<1x256xf32>
    %261 = vector.broadcast %257 : vector<1x1xf32> to vector<1x256xf32>
    %262 = arith.addf %260, %261 : vector<1x256xf32>
    %c0_166 = arith.constant 0 : index
    %c0_167 = arith.constant 0 : index
    %263 = vector.load %arg6[%c0_166, %c0_167] : memref<8x256xf32, #tpu.memory_space<vmem>>, vector<1x256xf32>
    tpu.vector_store %arg6[%c0_166, %c0_167], %262 {strides = array<i32>} : memref<8x256xf32, #tpu.memory_space<vmem>>, vector<1x256xf32>,
    %c4_168 = arith.constant 4 : index
    %c0_169 = arith.constant 0 : index
    %264 = vector.load %arg6[%c4_168, %c0_169] : memref<8x256xf32, #tpu.memory_space<vmem>>, vector<1x256xf32>
    %265 = vector.broadcast %253 : vector<1x1xf32> to vector<1x256xf32>
    %266 = arith.mulf %264, %265 : vector<1x256xf32>
    %267 = vector.broadcast %257 : vector<1x1xf32> to vector<1x256xf32>
    %268 = arith.addf %266, %267 : vector<1x256xf32>
    %c4_170 = arith.constant 4 : index
    %c0_171 = arith.constant 0 : index
    %269 = vector.load %arg6[%c4_170, %c0_171] : memref<8x256xf32, #tpu.memory_space<vmem>>, vector<1x256xf32>
    tpu.vector_store %arg6[%c4_170, %c0_171], %268 {strides = array<i32>} : memref<8x256xf32, #tpu.memory_space<vmem>>, vector<1x256xf32>,
    %cst_172 = arith.constant 0.000000e+00 : f32
    %270 = vector.broadcast %cst_172 : f32 to vector<1x1xf32>
    %c1_173 = arith.constant 1 : index
    %c0_174 = arith.constant 0 : index
    %271 = vector.load %arg6[%c1_173, %c0_174] : memref<8x256xf32, #tpu.memory_space<vmem>>, vector<1x256xf32>
    %cst_175 = arith.constant dense<0.000000e+00> : vector<1xf32>
    %272 = vector.multi_reduction <add>, %271, %cst_175 [1] : vector<1x256xf32> to vector<1xf32>
    %273 = vector.shape_cast %272 : vector<1xf32> to vector<1x1xf32>
    %274 = arith.addf %270, %273 : vector<1x1xf32>
    %c5_176 = arith.constant 5 : index
    %c0_177 = arith.constant 0 : index
    %275 = vector.load %arg6[%c5_176, %c0_177] : memref<8x256xf32, #tpu.memory_space<vmem>>, vector<1x256xf32>
    %cst_178 = arith.constant dense<0.000000e+00> : vector<1xf32>
    %276 = vector.multi_reduction <add>, %275, %cst_178 [1] : vector<1x256xf32> to vector<1xf32>
    %277 = vector.shape_cast %276 : vector<1xf32> to vector<1x1xf32>
    %278 = arith.addf %274, %277 : vector<1x1xf32>
    %cst_179 = arith.constant 0.001953125 : f32
    %279 = vector.broadcast %cst_179 : f32 to vector<1x1xf32>
    %280 = arith.mulf %278, %279 : vector<1x1xf32>
    %cst_180 = arith.constant 0.000000e+00 : f32
    %281 = vector.broadcast %cst_180 : f32 to vector<1x1xf32>
    %c1_181 = arith.constant 1 : index
    %c0_182 = arith.constant 0 : index
    %282 = vector.load %arg6[%c1_181, %c0_182] : memref<8x256xf32, #tpu.memory_space<vmem>>, vector<1x256xf32>
    %283 = vector.broadcast %280 : vector<1x1xf32> to vector<1x256xf32>
    %284 = arith.subf %282, %283 : vector<1x256xf32>
    %285 = arith.mulf %284, %284 : vector<1x256xf32>
    %cst_183 = arith.constant dense<0.000000e+00> : vector<1xf32>
    %286 = vector.multi_reduction <add>, %285, %cst_183 [1] : vector<1x256xf32> to vector<1xf32>
    %287 = vector.shape_cast %286 : vector<1xf32> to vector<1x1xf32>
    %288 = arith.addf %281, %287 : vector<1x1xf32>
    %c5_184 = arith.constant 5 : index
    %c0_185 = arith.constant 0 : index
    %289 = vector.load %arg6[%c5_184, %c0_185] : memref<8x256xf32, #tpu.memory_space<vmem>>, vector<1x256xf32>
    %290 = vector.broadcast %280 : vector<1x1xf32> to vector<1x256xf32>
    %291 = arith.subf %289, %290 : vector<1x256xf32>
    %292 = arith.mulf %291, %291 : vector<1x256xf32>
    %cst_186 = arith.constant dense<0.000000e+00> : vector<1xf32>
    %293 = vector.multi_reduction <add>, %292, %cst_186 [1] : vector<1x256xf32> to vector<1xf32>
    %294 = vector.shape_cast %293 : vector<1xf32> to vector<1x1xf32>
    %295 = arith.addf %288, %294 : vector<1x1xf32>
    %cst_187 = arith.constant 0.001953125 : f32
    %296 = vector.broadcast %cst_187 : f32 to vector<1x1xf32>
    %297 = arith.mulf %295, %296 : vector<1x1xf32>
    %cst_188 = arith.constant 0.000000e+00 : f32
    %298 = vector.broadcast %cst_188 : f32 to vector<1x1xf32>
    %299 = arith.maximumf %297, %298 : vector<1x1xf32>
    %c1_189 = arith.constant 1 : index
    %300 = memref.load %arg4[%c1_189] : memref<4xf32, #tpu.memory_space<smem>>
    %cst_190 = arith.constant 9.99999974E-6 : f32
    %301 = vector.broadcast %cst_190 : f32 to vector<1x1xf32>
    %302 = arith.addf %299, %301 : vector<1x1xf32>
    %303 = math.rsqrt %302 : vector<1x1xf32>
    %304 = vector.broadcast %300 : f32 to vector<1x1xf32>
    %305 = arith.mulf %304, %303 : vector<1x1xf32>
    %c1_191 = arith.constant 1 : index
    %306 = memref.load %arg5[%c1_191] : memref<4xf32, #tpu.memory_space<smem>>
    %307 = arith.mulf %280, %305 : vector<1x1xf32>
    %308 = vector.broadcast %306 : f32 to vector<1x1xf32>
    %309 = arith.subf %308, %307 : vector<1x1xf32>
    %c1_192 = arith.constant 1 : index
    %c0_193 = arith.constant 0 : index
    %310 = vector.load %arg6[%c1_192, %c0_193] : memref<8x256xf32, #tpu.memory_space<vmem>>, vector<1x256xf32>
    %311 = vector.broadcast %305 : vector<1x1xf32> to vector<1x256xf32>
    %312 = arith.mulf %310, %311 : vector<1x256xf32>
    %313 = vector.broadcast %309 : vector<1x1xf32> to vector<1x256xf32>
    %314 = arith.addf %312, %313 : vector<1x256xf32>
    %c1_194 = arith.constant 1 : index
    %c0_195 = arith.constant 0 : index
    %315 = vector.load %arg6[%c1_194, %c0_195] : memref<8x256xf32, #tpu.memory_space<vmem>>, vector<1x256xf32>
    tpu.vector_store %arg6[%c1_194, %c0_195], %314 {strides = array<i32>} : memref<8x256xf32, #tpu.memory_space<vmem>>, vector<1x256xf32>,
    %c5_196 = arith.constant 5 : index
    %c0_197 = arith.constant 0 : index
    %316 = vector.load %arg6[%c5_196, %c0_197] : memref<8x256xf32, #tpu.memory_space<vmem>>, vector<1x256xf32>
    %317 = vector.broadcast %305 : vector<1x1xf32> to vector<1x256xf32>
    %318 = arith.mulf %316, %317 : vector<1x256xf32>
    %319 = vector.broadcast %309 : vector<1x1xf32> to vector<1x256xf32>
    %320 = arith.addf %318, %319 : vector<1x256xf32>
    %c5_198 = arith.constant 5 : index
    %c0_199 = arith.constant 0 : index
    %321 = vector.load %arg6[%c5_198, %c0_199] : memref<8x256xf32, #tpu.memory_space<vmem>>, vector<1x256xf32>
    tpu.vector_store %arg6[%c5_198, %c0_199], %320 {strides = array<i32>} : memref<8x256xf32, #tpu.memory_space<vmem>>, vector<1x256xf32>,
    %cst_200 = arith.constant 0.000000e+00 : f32
    %322 = vector.broadcast %cst_200 : f32 to vector<1x1xf32>
    %c2_201 = arith.constant 2 : index
    %c0_202 = arith.constant 0 : index
    %323 = vector.load %arg6[%c2_201, %c0_202] : memref<8x256xf32, #tpu.memory_space<vmem>>, vector<1x256xf32>
    %cst_203 = arith.constant dense<0.000000e+00> : vector<1xf32>
    %324 = vector.multi_reduction <add>, %323, %cst_203 [1] : vector<1x256xf32> to vector<1xf32>
    %325 = vector.shape_cast %324 : vector<1xf32> to vector<1x1xf32>
    %326 = arith.addf %322, %325 : vector<1x1xf32>
    %c6_204 = arith.constant 6 : index
    %c0_205 = arith.constant 0 : index
    %327 = vector.load %arg6[%c6_204, %c0_205] : memref<8x256xf32, #tpu.memory_space<vmem>>, vector<1x256xf32>
    %cst_206 = arith.constant dense<0.000000e+00> : vector<1xf32>
    %328 = vector.multi_reduction <add>, %327, %cst_206 [1] : vector<1x256xf32> to vector<1xf32>
    %329 = vector.shape_cast %328 : vector<1xf32> to vector<1x1xf32>
    %330 = arith.addf %326, %329 : vector<1x1xf32>
    %cst_207 = arith.constant 0.001953125 : f32
    %331 = vector.broadcast %cst_207 : f32 to vector<1x1xf32>
    %332 = arith.mulf %330, %331 : vector<1x1xf32>
    %cst_208 = arith.constant 0.000000e+00 : f32
    %333 = vector.broadcast %cst_208 : f32 to vector<1x1xf32>
    %c2_209 = arith.constant 2 : index
    %c0_210 = arith.constant 0 : index
    %334 = vector.load %arg6[%c2_209, %c0_210] : memref<8x256xf32, #tpu.memory_space<vmem>>, vector<1x256xf32>
    %335 = vector.broadcast %332 : vector<1x1xf32> to vector<1x256xf32>
    %336 = arith.subf %334, %335 : vector<1x256xf32>
    %337 = arith.mulf %336, %336 : vector<1x256xf32>
    %cst_211 = arith.constant dense<0.000000e+00> : vector<1xf32>
    %338 = vector.multi_reduction <add>, %337, %cst_211 [1] : vector<1x256xf32> to vector<1xf32>
    %339 = vector.shape_cast %338 : vector<1xf32> to vector<1x1xf32>
    %340 = arith.addf %333, %339 : vector<1x1xf32>
    %c6_212 = arith.constant 6 : index
    %c0_213 = arith.constant 0 : index
    %341 = vector.load %arg6[%c6_212, %c0_213] : memref<8x256xf32, #tpu.memory_space<vmem>>, vector<1x256xf32>
    %342 = vector.broadcast %332 : vector<1x1xf32> to vector<1x256xf32>
    %343 = arith.subf %341, %342 : vector<1x256xf32>
    %344 = arith.mulf %343, %343 : vector<1x256xf32>
    %cst_214 = arith.constant dense<0.000000e+00> : vector<1xf32>
    %345 = vector.multi_reduction <add>, %344, %cst_214 [1] : vector<1x256xf32> to vector<1xf32>
    %346 = vector.shape_cast %345 : vector<1xf32> to vector<1x1xf32>
    %347 = arith.addf %340, %346 : vector<1x1xf32>
    %cst_215 = arith.constant 0.001953125 : f32
    %348 = vector.broadcast %cst_215 : f32 to vector<1x1xf32>
    %349 = arith.mulf %347, %348 : vector<1x1xf32>
    %cst_216 = arith.constant 0.000000e+00 : f32
    %350 = vector.broadcast %cst_216 : f32 to vector<1x1xf32>
    %351 = arith.maximumf %349, %350 : vector<1x1xf32>
    %c2_217 = arith.constant 2 : index
    %352 = memref.load %arg4[%c2_217] : memref<4xf32, #tpu.memory_space<smem>>
    %cst_218 = arith.constant 9.99999974E-6 : f32
    %353 = vector.broadcast %cst_218 : f32 to vector<1x1xf32>
    %354 = arith.addf %351, %353 : vector<1x1xf32>
    %355 = math.rsqrt %354 : vector<1x1xf32>
    %356 = vector.broadcast %352 : f32 to vector<1x1xf32>
    %357 = arith.mulf %356, %355 : vector<1x1xf32>
    %c2_219 = arith.constant 2 : index
    %358 = memref.load %arg5[%c2_219] : memref<4xf32, #tpu.memory_space<smem>>
    %359 = arith.mulf %332, %357 : vector<1x1xf32>
    %360 = vector.broadcast %358 : f32 to vector<1x1xf32>
    %361 = arith.subf %360, %359 : vector<1x1xf32>
    %c2_220 = arith.constant 2 : index
    %c0_221 = arith.constant 0 : index
    %362 = vector.load %arg6[%c2_220, %c0_221] : memref<8x256xf32, #tpu.memory_space<vmem>>, vector<1x256xf32>
    %363 = vector.broadcast %357 : vector<1x1xf32> to vector<1x256xf32>
    %364 = arith.mulf %362, %363 : vector<1x256xf32>
    %365 = vector.broadcast %361 : vector<1x1xf32> to vector<1x256xf32>
    %366 = arith.addf %364, %365 : vector<1x256xf32>
    %c2_222 = arith.constant 2 : index
    %c0_223 = arith.constant 0 : index
    %367 = vector.load %arg6[%c2_222, %c0_223] : memref<8x256xf32, #tpu.memory_space<vmem>>, vector<1x256xf32>
    tpu.vector_store %arg6[%c2_222, %c0_223], %366 {strides = array<i32>} : memref<8x256xf32, #tpu.memory_space<vmem>>, vector<1x256xf32>,
    %c6_224 = arith.constant 6 : index
    %c0_225 = arith.constant 0 : index
    %368 = vector.load %arg6[%c6_224, %c0_225] : memref<8x256xf32, #tpu.memory_space<vmem>>, vector<1x256xf32>
    %369 = vector.broadcast %357 : vector<1x1xf32> to vector<1x256xf32>
    %370 = arith.mulf %368, %369 : vector<1x256xf32>
    %371 = vector.broadcast %361 : vector<1x1xf32> to vector<1x256xf32>
    %372 = arith.addf %370, %371 : vector<1x256xf32>
    %c6_226 = arith.constant 6 : index
    %c0_227 = arith.constant 0 : index
    %373 = vector.load %arg6[%c6_226, %c0_227] : memref<8x256xf32, #tpu.memory_space<vmem>>, vector<1x256xf32>
    tpu.vector_store %arg6[%c6_226, %c0_227], %372 {strides = array<i32>} : memref<8x256xf32, #tpu.memory_space<vmem>>, vector<1x256xf32>,
    %cst_228 = arith.constant 0.000000e+00 : f32
    %374 = vector.broadcast %cst_228 : f32 to vector<1x1xf32>
    %c3_229 = arith.constant 3 : index
    %c0_230 = arith.constant 0 : index
    %375 = vector.load %arg6[%c3_229, %c0_230] : memref<8x256xf32, #tpu.memory_space<vmem>>, vector<1x256xf32>
    %cst_231 = arith.constant dense<0.000000e+00> : vector<1xf32>
    %376 = vector.multi_reduction <add>, %375, %cst_231 [1] : vector<1x256xf32> to vector<1xf32>
    %377 = vector.shape_cast %376 : vector<1xf32> to vector<1x1xf32>
    %378 = arith.addf %374, %377 : vector<1x1xf32>
    %c7_232 = arith.constant 7 : index
    %c0_233 = arith.constant 0 : index
    %379 = vector.load %arg6[%c7_232, %c0_233] : memref<8x256xf32, #tpu.memory_space<vmem>>, vector<1x256xf32>
    %cst_234 = arith.constant dense<0.000000e+00> : vector<1xf32>
    %380 = vector.multi_reduction <add>, %379, %cst_234 [1] : vector<1x256xf32> to vector<1xf32>
    %381 = vector.shape_cast %380 : vector<1xf32> to vector<1x1xf32>
    %382 = arith.addf %378, %381 : vector<1x1xf32>
    %cst_235 = arith.constant 0.001953125 : f32
    %383 = vector.broadcast %cst_235 : f32 to vector<1x1xf32>
    %384 = arith.mulf %382, %383 : vector<1x1xf32>
    %cst_236 = arith.constant 0.000000e+00 : f32
    %385 = vector.broadcast %cst_236 : f32 to vector<1x1xf32>
    %c3_237 = arith.constant 3 : index
    %c0_238 = arith.constant 0 : index
    %386 = vector.load %arg6[%c3_237, %c0_238] : memref<8x256xf32, #tpu.memory_space<vmem>>, vector<1x256xf32>
    %387 = vector.broadcast %384 : vector<1x1xf32> to vector<1x256xf32>
    %388 = arith.subf %386, %387 : vector<1x256xf32>
    %389 = arith.mulf %388, %388 : vector<1x256xf32>
    %cst_239 = arith.constant dense<0.000000e+00> : vector<1xf32>
    %390 = vector.multi_reduction <add>, %389, %cst_239 [1] : vector<1x256xf32> to vector<1xf32>
    %391 = vector.shape_cast %390 : vector<1xf32> to vector<1x1xf32>
    %392 = arith.addf %385, %391 : vector<1x1xf32>
    %c7_240 = arith.constant 7 : index
    %c0_241 = arith.constant 0 : index
    %393 = vector.load %arg6[%c7_240, %c0_241] : memref<8x256xf32, #tpu.memory_space<vmem>>, vector<1x256xf32>
    %394 = vector.broadcast %384 : vector<1x1xf32> to vector<1x256xf32>
    %395 = arith.subf %393, %394 : vector<1x256xf32>
    %396 = arith.mulf %395, %395 : vector<1x256xf32>
    %cst_242 = arith.constant dense<0.000000e+00> : vector<1xf32>
    %397 = vector.multi_reduction <add>, %396, %cst_242 [1] : vector<1x256xf32> to vector<1xf32>
    %398 = vector.shape_cast %397 : vector<1xf32> to vector<1x1xf32>
    %399 = arith.addf %392, %398 : vector<1x1xf32>
    %cst_243 = arith.constant 0.001953125 : f32
    %400 = vector.broadcast %cst_243 : f32 to vector<1x1xf32>
    %401 = arith.mulf %399, %400 : vector<1x1xf32>
    %cst_244 = arith.constant 0.000000e+00 : f32
    %402 = vector.broadcast %cst_244 : f32 to vector<1x1xf32>
    %403 = arith.maximumf %401, %402 : vector<1x1xf32>
    %c3_245 = arith.constant 3 : index
    %404 = memref.load %arg4[%c3_245] : memref<4xf32, #tpu.memory_space<smem>>
    %cst_246 = arith.constant 9.99999974E-6 : f32
    %405 = vector.broadcast %cst_246 : f32 to vector<1x1xf32>
    %406 = arith.addf %403, %405 : vector<1x1xf32>
    %407 = math.rsqrt %406 : vector<1x1xf32>
    %408 = vector.broadcast %404 : f32 to vector<1x1xf32>
    %409 = arith.mulf %408, %407 : vector<1x1xf32>
    %c3_247 = arith.constant 3 : index
    %410 = memref.load %arg5[%c3_247] : memref<4xf32, #tpu.memory_space<smem>>
    %411 = arith.mulf %384, %409 : vector<1x1xf32>
    %412 = vector.broadcast %410 : f32 to vector<1x1xf32>
    %413 = arith.subf %412, %411 : vector<1x1xf32>
    %c3_248 = arith.constant 3 : index
    %c0_249 = arith.constant 0 : index
    %414 = vector.load %arg6[%c3_248, %c0_249] : memref<8x256xf32, #tpu.memory_space<vmem>>, vector<1x256xf32>
    %415 = vector.broadcast %409 : vector<1x1xf32> to vector<1x256xf32>
    %416 = arith.mulf %414, %415 : vector<1x256xf32>
    %417 = vector.broadcast %413 : vector<1x1xf32> to vector<1x256xf32>
    %418 = arith.addf %416, %417 : vector<1x256xf32>
    %c3_250 = arith.constant 3 : index
    %c0_251 = arith.constant 0 : index
    %419 = vector.load %arg6[%c3_250, %c0_251] : memref<8x256xf32, #tpu.memory_space<vmem>>, vector<1x256xf32>
    tpu.vector_store %arg6[%c3_250, %c0_251], %418 {strides = array<i32>} : memref<8x256xf32, #tpu.memory_space<vmem>>, vector<1x256xf32>,
    %c7_252 = arith.constant 7 : index
    %c0_253 = arith.constant 0 : index
    %420 = vector.load %arg6[%c7_252, %c0_253] : memref<8x256xf32, #tpu.memory_space<vmem>>, vector<1x256xf32>
    %421 = vector.broadcast %409 : vector<1x1xf32> to vector<1x256xf32>
    %422 = arith.mulf %420, %421 : vector<1x256xf32>
    %423 = vector.broadcast %413 : vector<1x1xf32> to vector<1x256xf32>
    %424 = arith.addf %422, %423 : vector<1x256xf32>
    %c7_254 = arith.constant 7 : index
    %c0_255 = arith.constant 0 : index
    %425 = vector.load %arg6[%c7_254, %c0_255] : memref<8x256xf32, #tpu.memory_space<vmem>>, vector<1x256xf32>
    tpu.vector_store %arg6[%c7_254, %c0_255], %424 {strides = array<i32>} : memref<8x256xf32, #tpu.memory_space<vmem>>, vector<1x256xf32>,
    return
  }
}

</mosaic_0001>

<bundles_post_ra>
// kernel: dil_conv.1
= control target key start
LH: loop header
LB: loop body
LE: loop exit
PB: predicated region body
PF: predicated region fallthrough
CT: control target
= control target key end

     0   :  { %11 = vsyncpa [#allocation5], 0  ;;  %s1775_s0 = inlined_call_operand.vmem [shape: f32[8,256], index: 0, kind: input, shape index: {}]   ;;  %s1776_s1 = inlined_call_operand.vmem [shape: f32[8,9], index: 1, kind: input, shape index: {}]   ;;  %s1777_s2 = inlined_call_operand.vmem [shape: f32[9,256], index: 2, kind: input, shape index: {}]   ;;  %s1778_s3 = inlined_call_operand.vmem [shape: f32[4,4], index: 3, kind: input, shape index: {}]   ;;  %s1779_s4 = inlined_call_operand.vmem [shape: f32[4], index: 4, kind: input, shape index: {}]   ;;  %s1780_s5 = inlined_call_operand.vmem [shape: f32[4], index: 5, kind: input, shape index: {}]   ;;  %s1781_s6 = inlined_call_operand.vmem [shape: f32[8,256], index: 6, kind: output, shape index: {}]  }
   0x1   :  { %12 = vsyncpa [#allocation7], 0  ;;  %s35_s23 = sshll.u32 %s1779_s4, 4  ;;  %s25_s26 = sshll.u32 %s1778_s3, 4  ;;  %s36_s23 = int_to_ptr.vmem [resolvable:$true] %s35_s23  ;;  %s26_s26 = int_to_ptr.vmem [resolvable:$true] %s25_s26 }
   0x2   :  { %s1224_s27 = scalar_lea.vmem %s36_s23, 16  ;;  %p1229_p1 = scmp.lt.s32.totalorder %s36_s23, %s36_s23 }
   0x3   :  { %p1225_p0 = scmp.ne.s32.totalorder %s36_s23, %s1224_s27  ;;  %p1230_p2 = scmp.lt.s32.totalorder %s1224_s27, %s1224_s27 }
   0x5   :  { %p1231_p3 = por %p1230_p2, %p1229_p1 }
   0x7   :  { %p1232_p4 = pnand %p1231_p3, %p1225_p0 }
   0x9   :  { %1235 = shalt.err (!%p1232_p4)
}
   0xa   :  { %s1264_s28 = smov [#allocation6]   ;;  %s1236_s29 = scalar_lea.vmem %s26_s26, 64 }
   0xb   :  { %38 = dma.vmem_to_smem %s36_s23, 16, %s1264_s28, [#allocation7]  }
   0xc   :  { %p1237_p5 = scmp.ne.s32.totalorder %s26_s26, %s1236_s29  ;;  %p1241_p6 = scmp.lt.s32.totalorder %s26_s26, %s26_s26 }
   0xd   :  { %p1242_p7 = scmp.lt.s32.totalorder %s1236_s29, %s1236_s29 }
   0xf   :  { %p1243_p8 = por %p1242_p7, %p1241_p6 }
  0x11   :  { %p1244_p9 = pnand %p1243_p8, %p1237_p5 }
  0x13   :  { %1247 = shalt.err (!%p1244_p9)
}
  0x14   :  { %s1265_s4 = smov [#allocation4]   ;;  %s45_s7 = sshll.u32 %s1780_s5, 4  ;;  %s46_s7 = int_to_ptr.vmem [resolvable:$true] %s45_s7 }
  0x15   :  { %28 = dma.vmem_to_smem %s26_s26, 64, %s1265_s4, [#allocation5]  }
  0x16   :  { %s1248_s8 = scalar_lea.vmem %s46_s7, 16  ;;  %p1253_p11 = scmp.lt.s32.totalorder %s46_s7, %s46_s7 }
  0x17   :  { %p1249_p10 = scmp.ne.s32.totalorder %s46_s7, %s1248_s8  ;;  %p1254_p12 = scmp.lt.s32.totalorder %s1248_s8, %s1248_s8 }
  0x19   :  { %p1255_p13 = por %p1254_p12, %p1253_p11 }
  0x1b   :  { %p1256_p0 = pnand %p1255_p13, %p1249_p10 }
  0x1d   :  { %1259 = shalt.err (!%p1256_p0)
}
  0x1e   :  { %s1266_s9 = smov [#allocation8]  }
  0x1f   :  { %48 = dma.vmem_to_smem %s46_s7, 16, %s1266_s9, [#allocation7]  }
  0x20   :  { %1260 = dma.done.wait [#allocation5], 64  }
  0x21   :  { %1261 = vsyncadd [#allocation5], 4294967232 }
  0x22   :  { %1262 = dma.done.wait [#allocation7], 32  }
  0x23   :  { %1263 = vsyncadd [#allocation7], 4294967264 }
  0x24   :  { %58 = sfence }
  0x25   :  { %v1337_v0 = vld [vmem:[%s1776_s1] sm:$0xff]  ;;  %v1267_v1 = vmov 3   ;;  %v1268_v2 = vmov 1   ;;  %v82_v3 = vlaneseq  ;;  %v1269_v8 = vmov 4   ;;  %v63_v14 = vld [vmem:[%s1775_s0 + $0x8] sm:$0xff]  ;;  %s1272_s18 = smov 96  }
  0x26   :  { %1208 = vset.pattern.permute.xlu1 %v1267_v1  ;;  %1206 = vset.pattern.permute.xlu0 %v1268_v2  ;;  %v1111_v5 = vld [vmem:[%s1777_s2 + $0x1] ss:$8 sm:$0x3]  ;;  %v1270_v9 = vmov 2   ;;  %vm60_vm0 = vcmask 277504   ;;  %v1271_v15 = vmov 0.0  }
  0x27   :  { %204 = vperm.xlu1 %1208, %v1337_v0   ;;  %108 = vperm.xlu0 %1206, %v1337_v0   ;;  %v83_v4 = vshrl.u32 %v82_v3, 7  ;;  %v62_v12 = vld [vmem:[%s1775_s0] sm:$0xff]  ;;  %61 = vst.msk [vmem:[#allocation2 + $0x18] sm:$0xff] %vm60_vm0, %v1271_v15  ;;  %v1368_v18 = vmax.f32 %v63_v14, 0.0  ;;  %v1273_v19 = vmov 5   ;;  %v1274_v20 = vmov 6  }
  0x28   :  { %v1112_v13 = vld [vmem:[%s1777_s2 + $0x2] ss:$8 sm:$0x3]  ;;  %v1363_v16 = vmax.f32 %v62_v12, 0.0  ;;  %s1275_s0 = smov 98   ;;  %v1276_v24 = vmov 8  }
  0x29   :  { %v1345_v6 = vsub.s32 0, %v83_v4  ;;  %v1347_v7 = vsub.s32 1, %v83_v4  ;;  %v1113_v22 = vld [vmem:[%s1777_s2 + $0x3] ss:$8 sm:$0x3]  ;;  %s1277_s23 = smov 126  }
  0x2a   :  { %v1115_v25 = vld [vmem:[%s1777_s2 + $0x5] ss:$8 sm:$0x3]  ;;  %v1278_v26 = vmov 7   ;;  %s1279_s26 = smov 2   ;;  %s1280_s29 = smov 30  }
  0x2b   :  { %1209 = vset.pattern.permute.xlu1 %v1269_v8  ;;  %1207 = vset.pattern.permute.xlu0 %v1270_v9  ;;  %v118_v10 = vrot.slane %v1111_v5, %v1345_v6  ;;  %v122_v11 = vrot.slane %v1111_v5, %v1347_v7  ;;  %v166_v17 = vrot.slane %v1112_v13, %v1345_v6  ;;  %v1116_v29 = vld [vmem:[%s1777_s2 + $0x6] ss:$8 sm:$0x3]  ;;  %v1117_v31 = vld [vmem:[%s1777_s2 + $0x7] ss:$8 sm:$0x3] }
  0x2c   :  { %250 = vperm.xlu1 %1209, %v1337_v0   ;;  %156 = vperm.xlu0 %1207, %v1337_v0   ;;  %v170_v21 = vrot.slane %v1112_v13, %v1347_v7  ;;  %v214_v23 = vrot.slane %v1113_v22, %v1345_v6  ;;  %v218_v27 = vrot.slane %v1113_v22, %v1347_v7  ;;  %v1118_v34 = vld [vmem:[%s1777_s2 + $0x10] ss:$8 sm:$0x3]  ;;  %s1281_s30 = smov 32   ;;  %v1282_v37 = vmov 0   ;;  %s1283_s9 = smov 34  }
  0x2d   :  { %v301_v28 = vrot.slane %v1115_v25, %v1347_v7  ;;  %v349_v30 = vrot.slane %v1116_v29, %v1347_v7  ;;  %v297_v32 = vrot.slane %v1115_v25, %v1345_v6  ;;  %v397_v33 = vrot.slane %v1117_v31, %v1347_v7  ;;  %v72_v38 = vld [vmem:[%s1777_s2] ss:$8 sm:$0x3]  ;;  %s1284_s10 = smov 94   ;;  %s1285_s11 = smov 124  }
  0x2e   :  { %v345_v35 = vrot.slane %v1116_v29, %v1345_v6  ;;  %v445_v36 = vrot.slane %v1118_v34, %v1347_v7  ;;  %v393_v39 = vrot.slane %v1117_v31, %v1345_v6  ;;  %v85_v40 = vrot.slane %v72_v38, %v1345_v6  ;;  %v1114_v9 = vld [vmem:[%s1777_s2 + $0x4] ss:$8 sm:$0x3]  ;;  %s1286_s2 = smov 92   ;;  %s1287_s1 = smov 64  }
  0x2f   :  { %v441_v41 = vrot.slane %v1118_v34, %v1345_v6  ;;  %v89_v42 = vrot.slane %v72_v38, %v1347_v7  ;;  %vm127_vm1 = vcmask 785408   ;;  %vm175_vm2 = vcmask 801792   ;;  %s1288_s13 = smov 62   ;;  %s1289_s14 = smov 60  }
  0x30   :  { %123 = vrot.lane.b32.xlu1 %v118_v10, %s1272_s18  ;;  %125 = vrot.lane.b32.xlu0 %v122_v11, %s1272_s18  ;;  %vm144_vm3 = vcmask 1031168   ;;  %v259_v14 = vrot.slane %v1114_v9, %v1345_v6  ;;  %vm306_vm4 = vcmask 15360   ;;  %vm354_vm5 = vcmask 244736   ;;  %s1457_s15 = sld [smem:[#allocation4]]  ;;  %s1467_s19 = sld [smem:[#allocation4 + $0x81]] }
  0x31   :  { %1210 = vset.pattern.permute.xlu1 %v1273_v19  ;;  %1211 = vset.pattern.permute.xlu0 %v1274_v20  ;;  %v263_v19 = vrot.slane %v1114_v9, %v1347_v7  ;;  %vm402_vm6 = vcmask 261120   ;;  %vm192_vm7 = vcmask 1014784   ;;  %vm94_vm8 = vcmask 769024   ;;  %s1459_s16 = sld [smem:[#allocation4 + $0x80]]  ;;  %s1469_s20 = sld [smem:[#allocation4 + $0x101]] }
  0x32   :  { %vm323_vm9 = vcmask 752640   ;;  %vm371_vm10 = vcmask 523264   ;;  %vm419_vm11 = vcmask 506880   ;;  %vm466_vm12 = vcmask 490496   ;;  %s1461_s17 = sld [smem:[#allocation4 + $0x100]]  ;;  %s1471_s21 = sld [smem:[#allocation4 + $0x181]] }
  0x33   :  { %s1473_s22 = sld [smem:[#allocation4 + $0x2]]  ;;  %s1484_s27 = sld [smem:[#allocation4 + $0x83]]  ;;  %vm1496_vm13 = vcmp.lt.s32.totalorder %v82_v3, 256  ;;  %vm664_vm14 = vcmask 1040384  }
  0x34   :  { %287 = vperm.xlu1 %1210, %v1337_v0   ;;  %171 = vrot.lane.b32.xlu0 %v166_v17, %s1275_s0  ;;  %s1477_s24 = sld [smem:[#allocation4 + $0x102]]  ;;  %s1486_s28 = sld [smem:[#allocation4 + $0x103]] }
  0x35   :  { %s1479_s25 = sld [smem:[#allocation4 + $0x182]]  ;;  %s741_s7 = sld [smem:[#allocation8]] }
  0x36   :  { %s1161_s8 = sld [smem:[#allocation6 + $0x1]]  ;;  %s1702_s5 = sld [smem:[#allocation6 + $0x3]] }
  0x38   :  { %173 = vrot.lane.b32.xlu1 %v170_v21, %s1275_s0  ;;  %335 = vperm.xlu0 %1211, %v1337_v0   ;;  %s1465_s0 = sld [smem:[#allocation4 + $0x1]] }
  0x39   :  { %1213 = vset.pattern.permute.xlu1 %v1276_v24 }
  0x3c   :  { %219 = vrot.lane.b32.xlu1 %v214_v23, %s1277_s23  ;;  %1212 = vset.pattern.permute.xlu0 %v1278_v26 }
  0x3d   :  { %383 = vperm.xlu0 %1212, %v1337_v0  }
  0x40   :  { %221 = vrot.lane.b32.xlu1 %v218_v27, %s1277_s23 }
  0x41   :  { %304 = vrot.lane.b32.xlu0 %v301_v28, %s1279_s26 }
  0x42   :  { %1215 = vset.pattern.permute.xlu0 %v1276_v24 }
  0x44   :  { %431 = vperm.xlu1 %1213, %v1337_v0  }
  0x45   :  { %352 = vrot.lane.b32.xlu0 %v349_v30, %s1280_s29  ;;  %v283_v30 = vld [vmem:[#allocation2 + $0x18] sm:$0xff] }
  0x48   :  { %302 = vrot.lane.b32.xlu1 %v297_v32, %s1279_s26  ;;  %s1481_s26 = sld [smem:[#allocation4 + $0x3]] }
  0x49   :  { %400 = vrot.lane.b32.xlu0 %v397_v33, %s1281_s30  ;;  %1214 = vset.pattern.permute.xlu1 %v1282_v37 }
  0x4c   :  { %350 = vrot.lane.b32.xlu1 %v345_v35, %s1280_s29  ;;  %s1489_s29 = sld [smem:[#allocation4 + $0x183]] }
  0x4d   :  { %448 = vrot.lane.b32.xlu0 %v445_v36, %s1283_s9 }
  0x50   :  { %398 = vrot.lane.b32.xlu1 %v393_v39, %s1281_s30  ;;  %s736_s30 = sld [smem:[#allocation6]] }
  0x51   :  { %90 = vrot.lane.b32.xlu0 %v85_v40, %s1284_s10 }
  0x54   :  { %446 = vrot.lane.b32.xlu1 %v441_v41, %s1283_s9 }
  0x58   :  { %75 = vperm.xlu1 %1214, %v1337_v0  }
  0x5c   :  { %92 = vrot.lane.b32.xlu1 %v89_v42, %s1284_s10 }
  0xa6   :  { %v205_v43 = vpop.permute.xlu1 %204  ;;  %v109_v44 = vpop.permute.xlu0 %108 }
  0xa7   :  { %v111_v47 = vmul.f32 0.0, %v109_v44  ;;  %v112_v48 = vmul.f32 %v109_v44, %v1363_v16  ;;  %v113_v54 = vmul.f32 %v109_v44, %v1368_v18  ;;  %v207_v4 = vmul.f32 0.0, %v205_v43 }
  0xa8   :  { %v209_v10 = vmul.f32 %v205_v43, %v1368_v18  ;;  %v208_v11 = vmul.f32 %v205_v43, %v1363_v16 }
  0xab   :  { %v251_v45 = vpop.permute.xlu1 %250  ;;  %v157_v46 = vpop.permute.xlu0 %156 }
  0xac   :  { %v159_v55 = vmul.f32 0.0, %v157_v46  ;;  %v161_v60 = vmul.f32 %v157_v46, %v1368_v18  ;;  %v160_v61 = vmul.f32 %v157_v46, %v1363_v16  ;;  %v253_v20 = vmul.f32 %v251_v45, %v1363_v16 }
  0xad   :  { %v254_v21 = vmul.f32 %v251_v45, %v1368_v18 }
  0xae   :  { %v266_v24 = vmul.f32 %v259_v14, %v253_v20 }
  0xaf   :  { %v124_v49 = vpop.permute.xlu1 %123  ;;  %v126_v50 = vpop.permute.xlu0 %125  ;;  %v267_v25 = vmul.f32 %v263_v19, %v254_v21 }
  0xb0   :  { %v132_v51 = vmul.f32 %v124_v49, %v111_v47  ;;  %v128_v52 = vsel %vm127_vm1, %v124_v49, %v126_v50  ;;  %v134_v58 = vmul.f32 %v126_v50, %v113_v54 }
  0xb1   :  { %v133_v53 = vmul.f32 %v128_v52, %v112_v48 }
  0xb2   :  { %138 = vrot.lane.b32.xlu0 %v132_v51, %s1277_s23 }
  0xb3   :  { %v288_v56 = vpop.permute.xlu1 %287  ;;  %v172_v57 = vpop.permute.xlu0 %171  ;;  %140 = vrot.lane.b32.xlu1 %v133_v53, %s1277_s23 }
  0xb4   :  { %v180_v59 = vmul.f32 %v172_v57, %v159_v55  ;;  %v290_v27 = vmul.f32 %v288_v56, %v1363_v16  ;;  %v291_v28 = vmul.f32 %v288_v56, %v1368_v18  ;;  %v292_v35 = vmul.f32 %v288_v56, %v283_v30 }
  0xb6   :  { %142 = vrot.lane.b32.xlu0 %v134_v58, %s1277_s23  ;;  %s1475_s23 = sld [smem:[#allocation4 + $0x82]] }
  0xb7   :  { %v174_v62 = vpop.permute.xlu1 %173  ;;  %186 = vrot.lane.b32.xlu1 %v180_v59, %s1285_s11  ;;  %v336_v2 = vpop.permute.xlu0 %335 }
  0xb8   :  { %v176_v63 = vsel %vm175_vm2, %v172_v57, %v174_v62  ;;  %v182_v0 = vmul.f32 %v174_v62, %v161_v60  ;;  %v338_v34 = vmul.f32 %v336_v2, %v1363_v16  ;;  %v339_v41 = vmul.f32 %v336_v2, %v1368_v18 }
  0xb9   :  { %v181_v1 = vmul.f32 %v176_v63, %v160_v61  ;;  %v340_v42 = vmul.f32 %v336_v2, %v283_v30 }
  0xbb   :  { %v220_v5 = vpop.permute.xlu1 %219  ;;  %190 = vrot.lane.b32.xlu1 %v182_v0, %s1285_s11  ;;  %188 = vrot.lane.b32.xlu0 %v181_v1, %s1285_s11  ;;  %s1700_s11 = sld [smem:[#allocation8 + $0x2]] }
  0xbc   :  { %v227_v8 = vmul.f32 %v220_v5, %v207_v4  ;;  %v384_v12 = vpop.permute.xlu0 %383 }
  0xbd   :  { %v386_v48 = vmul.f32 %v384_v12, %v1363_v16  ;;  %v387_v49 = vmul.f32 %v384_v12, %v1368_v18  ;;  %v388_v53 = vmul.f32 %v384_v12, %v283_v30 }
  0xbf   :  { %v222_v13 = vpop.permute.xlu1 %221  ;;  %233 = vrot.lane.b32.xlu0 %v227_v8, %s1272_s18 }
  0xc0   :  { %v223_v15 = vsel %vm144_vm3, %v220_v5, %v222_v13  ;;  %v229_v17 = vmul.f32 %v222_v13, %v209_v10  ;;  %v305_v26 = vpop.permute.xlu0 %304 }
  0xc1   :  { %v228_v22 = vmul.f32 %v223_v15, %v208_v11  ;;  %v313_v39 = vmul.f32 %v305_v26, %v292_v35 }
  0xc3   :  { %v432_v23 = vpop.permute.xlu1 %431  ;;  %235 = vrot.lane.b32.xlu1 %v228_v22, %s1272_s18  ;;  %237 = vrot.lane.b32.xlu0 %v229_v17, %s1272_s18  ;;  %s1463_s18 = sld [smem:[#allocation4 + $0x180]] }
  0xc4   :  { %v353_v36 = vpop.permute.xlu0 %352  ;;  %v434_v54 = vmul.f32 %v432_v23, %v1363_v16  ;;  %v435_v59 = vmul.f32 %v432_v23, %v1368_v18  ;;  %v436_v60 = vmul.f32 %v432_v23, %v283_v30 }
  0xc5   :  { %v361_v44 = vmul.f32 %v353_v36, %v340_v42 }
  0xc7   :  { %v303_v29 = vpop.permute.xlu1 %302  ;;  %270 = vrot.lane.b32.xlu1 %v266_v24, %s1284_s10  ;;  %272 = vrot.lane.b32.xlu0 %v267_v25, %s1284_s10  ;;  %s1168_s10 = sld [smem:[#allocation6 + $0x2]] }
  0xc8   :  { %v307_v31 = vsel %vm306_vm4, %v303_v29, %v305_v26  ;;  %v311_v32 = vmul.f32 %v303_v29, %v290_v27  ;;  %v401_v45 = vpop.permute.xlu0 %400 }
  0xc9   :  { %v312_v33 = vmul.f32 %v307_v31, %v291_v28  ;;  %v409_v55 = vmul.f32 %v401_v45, %v388_v53 }
  0xcb   :  { %v351_v37 = vpop.permute.xlu1 %350  ;;  %317 = vrot.lane.b32.xlu1 %v311_v32, %s1286_s2  ;;  %319 = vrot.lane.b32.xlu0 %v312_v33, %s1286_s2 }
  0xcc   :  { %v359_v38 = vmul.f32 %v351_v37, %v338_v34  ;;  %v355_v40 = vsel %vm354_vm5, %v351_v37, %v353_v36  ;;  %v449_v56 = vpop.permute.xlu0 %448 }
  0xcd   :  { %v360_v46 = vmul.f32 %v355_v40, %v339_v41  ;;  %v456_v61 = vmul.f32 %v449_v56, %v436_v60 }
  0xcf   :  { %v399_v43 = vpop.permute.xlu1 %398  ;;  %321 = vrot.lane.b32.xlu1 %v313_v39, %s1286_s2  ;;  %365 = vrot.lane.b32.xlu0 %v359_v38, %s1287_s1 }
  0xd0   :  { %v403_v47 = vsel %vm402_vm6, %v399_v43, %v401_v45  ;;  %v407_v50 = vmul.f32 %v399_v43, %v386_v48  ;;  %v91_v0 = vpop.permute.xlu0 %90 }
  0xd1   :  { %v408_v51 = vmul.f32 %v403_v47, %v387_v49 }
  0xd3   :  { %367 = vrot.lane.b32.xlu1 %v360_v46, %s1287_s1  ;;  %369 = vrot.lane.b32.xlu0 %v361_v44, %s1287_s1  ;;  %v447_v52 = vpop.permute.xlu1 %446  ;;  %s1711_s1 = sld [smem:[#allocation8 + $0x3]] }
  0xd4   :  { %v454_v57 = vmul.f32 %v447_v52, %v434_v54  ;;  %v450_v58 = vsel %vm60_vm0, %v447_v52, %v449_v56 }
  0xd5   :  { %v455_v62 = vmul.f32 %v450_v58, %v435_v59 }
  0xd7   :  { %413 = vrot.lane.b32.xlu1 %v407_v50, %s1288_s13  ;;  %415 = vrot.lane.b32.xlu0 %v408_v51, %s1288_s13  ;;  %v76_v63 = vpop.permute.xlu1 %75 }
  0xd8   :  { %v78_v14 = vmul.f32 0.0, %v76_v63  ;;  %v79_v25 = vmul.f32 %v76_v63, %v1363_v16  ;;  %v80_v26 = vmul.f32 %v76_v63, %v1368_v18 }
  0xda   :  { %v99_v20 = vmul.f32 %v91_v0, %v78_v14 }
  0xdb   :  { %417 = vrot.lane.b32.xlu1 %v409_v55, %s1288_s13  ;;  %460 = vrot.lane.b32.xlu0 %v454_v57, %s1289_s14  ;;  %v93_v1 = vpop.permute.xlu1 %92 }
  0xdc   :  { %v95_v28 = vsel %vm94_vm8, %v91_v0, %v93_v1  ;;  %v101_v35 = vmul.f32 %v93_v1, %v80_v26  ;;  %v522_v26 = vstv %s1467_s19 }
  0xdd   :  { %v100_v34 = vmul.f32 %v95_v28, %v79_v25  ;;  %v519_v25 = vstv %s1465_s0  ;;  %v530_v28 = vstv %s1471_s21 }
  0xdf   :  { %462 = vrot.lane.b32.xlu1 %v455_v62, %s1289_s14  ;;  %464 = vrot.lane.b32.xlu0 %v456_v61, %s1289_s14 }
 0x124   :  { %v139_v2 = vpop.permute.xlu0 %138 }
 0x125   :  { %v141_v4 = vpop.permute.xlu1 %140 }
 0x126   :  { %v145_v19 = vsel %vm144_vm3, %v139_v2, %v141_v4 }
 0x127   :  { %v150_v24 = vadd.f32 %v145_v19, %v99_v20  ;;  %v498_v20 = vstv %s1457_s15 }
 0x128   :  { %v143_v5 = vpop.permute.xlu0 %142 }
 0x129   :  { %v187_v8 = vpop.permute.xlu1 %186  ;;  %v146_v32 = vsel %vm144_vm3, %v141_v4, %v143_v5  ;;  %v152_v38 = vadd.f32 %v143_v5, %v101_v35  ;;  %v562_v35 = vstv %s1486_s28 }
 0x12a   :  { %v151_v37 = vadd.f32 %v146_v32, %v100_v34  ;;  %v548_v32 = vstv %s1479_s25  ;;  %v558_v34 = vstv %s1484_s27 }
 0x12d   :  { %v189_v9 = vpop.permute.xlu0 %188  ;;  %v191_v10 = vpop.permute.xlu1 %190 }
 0x12e   :  { %v193_v21 = vsel %vm192_vm7, %v187_v8, %v189_v9  ;;  %v194_v36 = vsel %vm192_vm7, %v189_v9, %v191_v10  ;;  %v200_v41 = vadd.f32 %v191_v10, %v152_v38 }
 0x12f   :  { %v198_v29 = vadd.f32 %v193_v21, %v150_v24  ;;  %v199_v42 = vadd.f32 %v194_v36, %v151_v37  ;;  %v501_v21 = vstv %s1459_s16 }
 0x131   :  { %v234_v11 = vpop.permute.xlu0 %233 }
 0x135   :  { %v236_v12 = vpop.permute.xlu1 %235  ;;  %v238_v13 = vpop.permute.xlu0 %237 }
 0x136   :  { %v239_v27 = vsel %vm127_vm1, %v234_v11, %v236_v12  ;;  %v240_v18 = vsel %vm127_vm1, %v236_v12, %v238_v13  ;;  %v246_v46 = vadd.f32 %v238_v13, %v200_v41  ;;  %v566_v41 = vstv %s1489_s29 }
 0x137   :  { %v244_v33 = vadd.f32 %v239_v27, %v198_v29  ;;  %v245_v45 = vadd.f32 %v240_v18, %v199_v42  ;;  %v526_v27 = vstv %s1469_s20  ;;  %v537_v29 = vstv %s1473_s22 }
 0x139   :  { %v271_v15 = vpop.permute.xlu1 %270  ;;  %v273_v17 = vpop.permute.xlu0 %272 }
 0x13a   :  { %v278_v40 = vadd.f32 %v271_v15, %v244_v33  ;;  %v274_v43 = vsel %vm94_vm8, %v271_v15, %v273_v17  ;;  %v280_v53 = vadd.f32 %v273_v17, %v246_v46  ;;  %v555_v33 = vstv %s1481_s26 }
 0x13b   :  { %v279_v52 = vadd.f32 %v274_v43, %v245_v45 }
 0x13d   :  { %v318_v22 = vpop.permute.xlu1 %317  ;;  %v320_v23 = vpop.permute.xlu0 %319 }
 0x13e   :  { %v329_v44 = vadd.f32 %v318_v22, %v278_v40  ;;  %v324_v49 = vsel %vm323_vm9, %v318_v22, %v320_v23  ;;  %v505_v22 = vstv %s1461_s17 }
 0x13f   :  { %v330_v57 = vadd.f32 %v324_v49, %v279_v52 }
 0x141   :  { %v322_v30 = vpop.permute.xlu1 %321  ;;  %v366_v31 = vpop.permute.xlu0 %365 }
 0x142   :  { %v325_v50 = vsel %vm323_vm9, %v320_v23, %v322_v30  ;;  %v377_v51 = vadd.f32 %v366_v31, %v329_v44  ;;  %v509_v23 = vstv %s1463_s18  ;;  %v540_v30 = vstv %s1475_s23 }
 0x143   :  { %v331_v58 = vadd.f32 %v325_v50, %v280_v53 }
 0x145   :  { %v368_v39 = vpop.permute.xlu1 %367  ;;  %v370_v16 = vpop.permute.xlu0 %369 }
 0x146   :  { %v372_v54 = vsel %vm371_vm10, %v366_v31, %v368_v39  ;;  %v373_v55 = vsel %vm371_vm10, %v368_v39, %v370_v16  ;;  %v544_v31 = vstv %s1477_s24 }
 0x147   :  { %v378_v0 = vadd.f32 %v372_v54, %v330_v57  ;;  %v379_v1 = vadd.f32 %v373_v55, %v331_v58 }
 0x149   :  { %v414_v47 = vpop.permute.xlu1 %413  ;;  %v416_v48 = vpop.permute.xlu0 %415 }
 0x14a   :  { %v425_v56 = vadd.f32 %v414_v47, %v377_v51  ;;  %v420_v61 = vsel %vm419_vm11, %v414_v47, %v416_v48 }
 0x14b   :  { %v426_v2 = vadd.f32 %v420_v61, %v378_v0 }
 0x14d   :  { %v418_v59 = vpop.permute.xlu1 %417  ;;  %v461_v60 = vpop.permute.xlu0 %460 }
 0x14e   :  { %v421_v62 = vsel %vm419_vm11, %v416_v48, %v418_v59  ;;  %v472_v63 = vadd.f32 %v461_v60, %v425_v56 }
 0x14f   :  { %v427_v4 = vadd.f32 %v421_v62, %v379_v1 }
 0x150   :  { %478 = vrot.lane.b32.xlu1 %v472_v63, %s1283_s9 }
 0x151   :  { %v463_v5 = vpop.permute.xlu1 %462  ;;  %v465_v8 = vpop.permute.xlu0 %464 }
 0x152   :  { %v467_v9 = vsel %vm466_vm12, %v461_v60, %v463_v5  ;;  %v468_v10 = vsel %vm466_vm12, %v463_v5, %v465_v8 }
 0x153   :  { %v473_v11 = vadd.f32 %v467_v9, %v426_v2  ;;  %v474_v12 = vadd.f32 %v468_v10, %v427_v4 }
 0x155   :  { %480 = vrot.lane.b32.xlu0 %v473_v11, %s1283_s9  ;;  %482 = vrot.lane.b32.xlu1 %v474_v12, %s1283_s9  ;;  %s1162_s9 = sld [smem:[#allocation8 + $0x1]] }
 0x1c2   :  { %v479_v13 = vpop.permute.xlu1 %478 }
 0x1c7   :  { %v481_v14 = vpop.permute.xlu0 %480  ;;  %v483_v15 = vpop.permute.xlu1 %482 }
 0x1c8   :  { %v484_v17 = vsel %vm60_vm0, %v479_v13, %v481_v14  ;;  %v485_v19 = vsel %vm60_vm0, %v481_v14, %v483_v15 }
 0x1c9   :  { %488 = vst [vmem:[#allocation3] sm:$0xff] %v484_v17  ;;  %489 = vst [vmem:[#allocation3 + $0x8] sm:$0xff] %v485_v19 }
 0x1d0   :  { %v490_v36 = vld [vmem:[#allocation3] ss:$8 sm:$0x3]  ;;  %v492_v37 = vld [vmem:[#allocation3 + $0x1] ss:$8 sm:$0x3] }
 0x1d1   :  { %v494_v38 = vld [vmem:[#allocation3 + $0x2] ss:$8 sm:$0x3]  ;;  %v496_v3 = vld [vmem:[#allocation3 + $0x3] ss:$8 sm:$0x3]  ;;  %v499_v39 = vmul.f32 %v498_v20, %v490_v36  ;;  %v502_v16 = vmul.f32 %v501_v21, %v492_v37  ;;  %v520_v18 = vmul.f32 %v519_v25, %v490_v36  ;;  %v523_v40 = vmul.f32 %v522_v26, %v492_v37 }
 0x1d2   :  { %v506_v42 = vmul.f32 %v505_v22, %v494_v38  ;;  %v510_v43 = vmul.f32 %v509_v23, %v496_v3  ;;  %v527_v44 = vmul.f32 %v526_v27, %v494_v38  ;;  %v538_v47 = vmul.f32 %v537_v29, %v490_v36  ;;  %v573_v49 = vld [vmem:[#allocation3 + $0x4] ss:$8 sm:$0x3]  ;;  %v575_v50 = vld [vmem:[#allocation3 + $0x5] ss:$8 sm:$0x3] }
 0x1d3   :  { %v503_v45 = vadd.f32 %v502_v16, %v499_v39  ;;  %v524_v46 = vadd.f32 %v523_v40, %v520_v18  ;;  %v541_v48 = vmul.f32 %v540_v30, %v492_v37  ;;  %v531_v51 = vmul.f32 %v530_v28, %v496_v3  ;;  %v577_v59 = vld [vmem:[#allocation3 + $0x6] ss:$8 sm:$0x3]  ;;  %v579_v62 = vld [vmem:[#allocation3 + $0x7] ss:$8 sm:$0x3] }
 0x1d4   :  { %v545_v52 = vmul.f32 %v544_v31, %v494_v38  ;;  %v556_v53 = vmul.f32 %v555_v33, %v490_v36  ;;  %v559_v54 = vmul.f32 %v558_v34, %v492_v37  ;;  %v549_v58 = vmul.f32 %v548_v32, %v496_v3 }
 0x1d5   :  { %v507_v55 = vadd.f32 %v506_v42, %v503_v45  ;;  %v528_v56 = vadd.f32 %v527_v44, %v524_v46  ;;  %v542_v57 = vadd.f32 %v541_v48, %v538_v47  ;;  %v563_v61 = vmul.f32 %v562_v35, %v494_v38 }
 0x1d6   :  { %v560_v60 = vadd.f32 %v559_v54, %v556_v53  ;;  %v582_v63 = vmul.f32 %v573_v49, %v498_v20  ;;  %v585_v0 = vmul.f32 %v575_v50, %v501_v21  ;;  %v567_v5 = vmul.f32 %v566_v41, %v496_v3 }
 0x1d7   :  { %v511_v1 = vadd.f32 %v510_v43, %v507_v55  ;;  %v532_v2 = vadd.f32 %v531_v51, %v528_v56  ;;  %v546_v4 = vadd.f32 %v545_v52, %v542_v57  ;;  %v589_v10 = vmul.f32 %v577_v59, %v505_v22 }
 0x1d8   :  { %v564_v8 = vadd.f32 %v563_v61, %v560_v60  ;;  %v586_v9 = vadd.f32 %v585_v0, %v582_v63  ;;  %v600_v11 = vmul.f32 %v573_v49, %v519_v25  ;;  %v593_v13 = vmul.f32 %v579_v62, %v509_v23 }
 0x1d9   :  { %516 = vst.msk [vmem:[%s1781_s6] ss:$8 sm:$0x3] %vm1496_vm13, %v511_v1  ;;  %1126 = vst.msk [vmem:[%s1781_s6 + $0x1] ss:$8 sm:$0x3] %vm1496_vm13, %v532_v2  ;;  %v550_v12 = vadd.f32 %v549_v58, %v546_v4  ;;  %v603_v14 = vmul.f32 %v575_v50, %v522_v26  ;;  %v618_v19 = vmul.f32 %v573_v49, %v537_v29 }
 0x1da   :  { %v568_v15 = vadd.f32 %v567_v5, %v564_v8  ;;  %v590_v17 = vadd.f32 %v589_v10, %v586_v9  ;;  %v621_v20 = vmul.f32 %v575_v50, %v540_v30  ;;  %v607_v22 = vmul.f32 %v577_v59, %v526_v27 }
 0x1db   :  { %1131 = vst.msk [vmem:[%s1781_s6 + $0x2] ss:$8 sm:$0x3] %vm1496_vm13, %v550_v12  ;;  %v604_v21 = vadd.f32 %v603_v14, %v600_v11  ;;  %v636_v25 = vmul.f32 %v573_v49, %v555_v33  ;;  %v625_v29 = vmul.f32 %v577_v59, %v544_v31  ;;  %v639_v36 = vmul.f32 %v575_v50, %v558_v34 }
 0x1dc   :  { %1136 = vst.msk [vmem:[%s1781_s6 + $0x3] ss:$8 sm:$0x3] %vm1496_vm13, %v568_v15  ;;  %v594_v23 = vadd.f32 %v593_v13, %v590_v17  ;;  %v622_v26 = vadd.f32 %v621_v20, %v618_v19  ;;  %v611_v37 = vmul.f32 %v579_v62, %v530_v28  ;;  %v629_v3 = vmul.f32 %v579_v62, %v548_v32 }
 0x1dd   :  { %v608_v30 = vadd.f32 %v607_v22, %v604_v21  ;;  %v640_v39 = vadd.f32 %v639_v36, %v636_v25  ;;  %v643_v27 = vmul.f32 %v577_v59, %v562_v35  ;;  %v647_v34 = vmul.f32 %v579_v62, %v566_v41 }
 0x1de   :  { %v626_v38 = vadd.f32 %v625_v29, %v622_v26  ;;  %1140 = vst.msk [vmem:[%s1781_s6 + $0x4] ss:$8 sm:$0x3] %vm1496_vm13, %v594_v23 }
 0x1df   :  { %v612_v33 = vadd.f32 %v611_v37, %v608_v30  ;;  %v644_v31 = vadd.f32 %v643_v27, %v640_v39 }
 0x1e0   :  { %v630_v16 = vadd.f32 %v629_v3, %v626_v38  ;;  %v1552_v28 = vld [vmem:[%s1781_s6] ss:$8 sm:$0x3]  ;;  %v1557_v32 = vld [vmem:[%s1781_s6 + $0x1] ss:$8 sm:$0x3] }
 0x1e1   :  { %1145 = vst.msk [vmem:[%s1781_s6 + $0x5] ss:$8 sm:$0x3] %vm1496_vm13, %v612_v33  ;;  %v657_v35 = vrot.slane %v1552_v28, %v1345_v6  ;;  %v661_v18 = vrot.slane %v1552_v28, %v1347_v7  ;;  %v771_v40 = vrot.slane %v1557_v32, %v1345_v6  ;;  %v775_v41 = vrot.slane %v1557_v32, %v1347_v7 }
 0x1e2   :  { %v648_v42 = vadd.f32 %v647_v34, %v644_v31  ;;  %1150 = vst.msk [vmem:[%s1781_s6 + $0x6] ss:$8 sm:$0x3] %vm1496_vm13, %v630_v16  ;;  %v1580_v43 = vld [vmem:[%s1781_s6 + $0x2] ss:$8 sm:$0x3] }
 0x1e3   :  { %v665_v44 = vsel %vm664_vm14, %v657_v35, 0.0  ;;  %v666_v45 = vsel %vm664_vm14, %v661_v18, 0.0  ;;  %v884_v47 = vrot.slane %v1580_v43, %v1345_v6  ;;  %v888_v49 = vrot.slane %v1580_v43, %v1347_v7  ;;  %v1603_v54 = vld [vmem:[%s1781_s6 + $0x3] ss:$8 sm:$0x3] }
 0x1e4   :  { %1155 = vst.msk [vmem:[%s1781_s6 + $0x7] ss:$8 sm:$0x3] %vm1496_vm13, %v648_v42  ;;  %v667_v46 = vadd.f32 %v666_v45, %v665_v44  ;;  %v778_v50 = vsel %vm664_vm14, %v771_v40, 0.0  ;;  %v779_v51 = vsel %vm664_vm14, %v775_v41, 0.0  ;;  %v997_v1 = vrot.slane %v1603_v54, %v1345_v6 }
 0x1e5   :  { %v1156_v48 = vld [vmem:[%s1781_s6 + $0x4] ss:$8 sm:$0x3]  ;;  %v891_v57 = vsel %vm664_vm14, %v884_v47, 0.0  ;;  %v780_v58 = vadd.f32 %v779_v51, %v778_v50  ;;  %v892_v61 = vsel %vm664_vm14, %v888_v49, 0.0  ;;  %v1001_v2 = vrot.slane %v1603_v54, %v1347_v7 }
 0x1e6   :  { %v676_v52 = vrot.slane %v1156_v48, %v1345_v6  ;;  %v680_v53 = vrot.slane %v1156_v48, %v1347_v7  ;;  %668 = vadd.xlane.f32.xlu0 %v667_v46  ;;  %v893_v11 = vadd.f32 %v892_v61, %v891_v57  ;;  %v1004_v19 = vsel %vm664_vm14, %v997_v1, 0.0 }
 0x1e7   :  { %v1005_v20 = vsel %vm664_vm14, %v1001_v2, 0.0 }
 0x1e8   :  { %v683_v55 = vsel %vm664_vm14, %v676_v52, 0.0  ;;  %v684_v56 = vsel %vm664_vm14, %v680_v53, 0.0  ;;  %v1160_v59 = vld [vmem:[%s1781_s6 + $0x5] ss:$8 sm:$0x3]  ;;  %v1006_v22 = vadd.f32 %v1005_v20, %v1004_v19 }
 0x1e9   :  { %v685_v60 = vadd.f32 %v684_v56, %v683_v55  ;;  %v789_v62 = vrot.slane %v1160_v59, %v1345_v6  ;;  %v793_v63 = vrot.slane %v1160_v59, %v1347_v7  ;;  %v1617_v0 = vld [vmem:[%s1781_s6 + $0x6] ss:$8 sm:$0x3] }
 0x1ea   :  { %781 = vadd.xlane.f32.xlu0 %v780_v58  ;;  %v902_v4 = vrot.slane %v1617_v0, %v1345_v6  ;;  %v906_v5 = vrot.slane %v1617_v0, %v1347_v7 }
 0x1eb   :  { %686 = vadd.xlane.f32.xlu1 %v685_v60  ;;  %v796_v8 = vsel %vm664_vm14, %v789_v62, 0.0  ;;  %v797_v9 = vsel %vm664_vm14, %v793_v63, 0.0  ;;  %v1632_v10 = vld [vmem:[%s1781_s6 + $0x7] ss:$8 sm:$0x3] }
 0x1ec   :  { %v798_v12 = vadd.f32 %v797_v9, %v796_v8  ;;  %v909_v13 = vsel %vm664_vm14, %v902_v4, 0.0  ;;  %v910_v14 = vsel %vm664_vm14, %v906_v5, 0.0  ;;  %v1015_v15 = vrot.slane %v1632_v10, %v1345_v6 }
 0x1ed   :  { %v1019_v17 = vrot.slane %v1632_v10, %v1347_v7  ;;  %v911_v21 = vadd.f32 %v910_v14, %v909_v13 }
 0x1ee   :  { %799 = vadd.xlane.f32.xlu0 %v798_v12  ;;  %v1022_v25 = vsel %vm664_vm14, %v1015_v15, 0.0 }
 0x1ef   :  { %894 = vadd.xlane.f32.xlu1 %v893_v11  ;;  %v1023_v23 = vsel %vm664_vm14, %v1019_v17, 0.0 }
 0x1f0   :  { %v1024_v26 = vadd.f32 %v1023_v23, %v1022_v25 }
 0x1f2   :  { %912 = vadd.xlane.f32.xlu0 %v911_v21 }
 0x1f3   :  { %1007 = vadd.xlane.f32.xlu1 %v1006_v22 }
 0x1f6   :  { %1025 = vadd.xlane.f32.xlu0 %v1024_v26 }
 0x273   :  { %v669_v29 = vpop.xlane.xlu0 %668 }
 0x277   :  { %v782_v36 = vpop.xlane.xlu0 %781 }
 0x278   :  { %v687_v30 = vpop.xlane.xlu1 %686 }
 0x279   :  { %v688_v37 = vadd.f32 %v687_v30, %v669_v29 }
 0x27b   :  { %v1644_v38 = vmul.f32 0.001953125, %v688_v37  ;;  %v800_v3 = vpop.xlane.xlu0 %799 }
 0x27c   :  { %v801_v39 = vadd.f32 %v800_v3, %v782_v36  ;;  %v895_v33 = vpop.xlane.xlu1 %894 }
 0x27d   :  { %v694_v27 = vrot.slane %v1644_v38, %v1345_v6 }
 0x27e   :  { %v1648_v16 = vmul.f32 0.001953125, %v801_v39 }
 0x27f   :  { %v696_v31 = vsub.f32 %v1552_v28, %v694_v27  ;;  %v715_v34 = vsub.f32 %v1156_v48, %v694_v27  ;;  %v913_v35 = vpop.xlane.xlu0 %912 }
 0x280   :  { %v807_v18 = vrot.slane %v1648_v16, %v1345_v6  ;;  %v914_v40 = vadd.f32 %v913_v35, %v895_v33  ;;  %v1008_v47 = vpop.xlane.xlu1 %1007 }
 0x281   :  { %v697_v41 = vmul.f32 %v696_v31, %v696_v31  ;;  %v716_v42 = vmul.f32 %v715_v34, %v715_v34 }
 0x282   :  { %v809_v44 = vsub.f32 %v1557_v32, %v807_v18  ;;  %v828_v45 = vsub.f32 %v1160_v59, %v807_v18  ;;  %v1654_v46 = vmul.f32 0.001953125, %v914_v40 }
 0x283   :  { %v721_v49 = vrot.slane %v716_v42, %v1345_v6  ;;  %v725_v50 = vrot.slane %v716_v42, %v1347_v7  ;;  %v702_v51 = vrot.slane %v697_v41, %v1345_v6  ;;  %v706_v48 = vrot.slane %v697_v41, %v1347_v7  ;;  %v1026_v52 = vpop.xlane.xlu0 %1025 }
 0x284   :  { %v810_v53 = vmul.f32 %v809_v44, %v809_v44  ;;  %v829_v55 = vmul.f32 %v828_v45, %v828_v45  ;;  %v920_v56 = vrot.slane %v1654_v46, %v1345_v6  ;;  %v1027_v57 = vadd.f32 %v1026_v52, %v1008_v47 }
 0x285   :  { %v728_v58 = vsel %vm664_vm14, %v721_v49, 0.0  ;;  %v729_v59 = vsel %vm664_vm14, %v725_v50, 0.0  ;;  %v709_v60 = vsel %vm664_vm14, %v702_v51, 0.0  ;;  %v710_v61 = vsel %vm664_vm14, %v706_v48, 0.0 }
 0x286   :  { %v922_v62 = vsub.f32 %v1580_v43, %v920_v56  ;;  %v941_v63 = vsub.f32 %v1617_v0, %v920_v56  ;;  %v730_v1 = vadd.f32 %v729_v59, %v728_v58  ;;  %v711_v2 = vadd.f32 %v710_v61, %v709_v60 }
 0x287   :  { %v1668_v4 = vmul.f32 0.001953125, %v1027_v57  ;;  %v834_v5 = vrot.slane %v829_v55, %v1345_v6  ;;  %v838_v8 = vrot.slane %v829_v55, %v1347_v7  ;;  %v815_v9 = vrot.slane %v810_v53, %v1345_v6 }
 0x288   :  { %v923_v11 = vmul.f32 %v922_v62, %v922_v62  ;;  %v942_v12 = vmul.f32 %v941_v63, %v941_v63  ;;  %731 = vadd.xlane.f32.xlu0 %v730_v1  ;;  %712 = vadd.xlane.f32.xlu1 %v711_v2  ;;  %v819_v13 = vrot.slane %v810_v53, %v1347_v7 }
 0x289   :  { %v1033_v14 = vrot.slane %v1668_v4, %v1345_v6  ;;  %v841_v0 = vsel %vm664_vm14, %v834_v5, 0.0  ;;  %v842_v15 = vsel %vm664_vm14, %v838_v8, 0.0  ;;  %v822_v17 = vsel %vm664_vm14, %v815_v9, 0.0 }
 0x28a   :  { %v843_v19 = vadd.f32 %v842_v15, %v841_v0  ;;  %v823_v20 = vsel %vm664_vm14, %v819_v13, 0.0  ;;  %v947_v21 = vrot.slane %v942_v12, %v1345_v6  ;;  %v951_v22 = vrot.slane %v942_v12, %v1347_v7 }
 0x28b   :  { %v1035_v25 = vsub.f32 %v1603_v54, %v1033_v14  ;;  %v1054_v23 = vsub.f32 %v1632_v10, %v1033_v14  ;;  %v824_v26 = vadd.f32 %v823_v20, %v822_v17  ;;  %v928_v29 = vrot.slane %v923_v11, %v1345_v6 }
 0x28c   :  { %844 = vadd.xlane.f32.xlu0 %v843_v19  ;;  %v954_v36 = vsel %vm664_vm14, %v947_v21, 0.0  ;;  %v955_v30 = vsel %vm664_vm14, %v951_v22, 0.0  ;;  %v932_v37 = vrot.slane %v923_v11, %v1347_v7  ;;  %v739_v13 = vstv %s736_s30 }
 0x28d   :  { %v1036_v3 = vmul.f32 %v1035_v25, %v1035_v25  ;;  %v1055_v39 = vmul.f32 %v1054_v23, %v1054_v23  ;;  %825 = vadd.xlane.f32.xlu1 %v824_v26  ;;  %v956_v27 = vadd.f32 %v955_v30, %v954_v36  ;;  %v935_v33 = vsel %vm664_vm14, %v928_v29, 0.0  ;;  %v1157_v26 = vld [vmem:[%s1781_s6 + $0x4] ss:$8 sm:$0x3] }
 0x28e   :  { %v936_v31 = vsel %vm664_vm14, %v932_v37, 0.0  ;;  %v743_v19 = vstv %s741_s7  ;;  %v852_v22 = vstv %s1161_s8  ;;  %v856_v29 = vstv %s1162_s9 }
 0x28f   :  { %v937_v34 = vadd.f32 %v936_v31, %v935_v33  ;;  %v1060_v10 = vrot.slane %v1055_v39, %v1345_v6  ;;  %v1064_v35 = vrot.slane %v1055_v39, %v1347_v7  ;;  %v1041_v18 = vrot.slane %v1036_v3, %v1345_v6 }
 0x290   :  { %957 = vadd.xlane.f32.xlu0 %v956_v27  ;;  %v1045_v40 = vrot.slane %v1036_v3, %v1347_v7  ;;  %v965_v3 = vstv %s1168_s10 }
 0x291   :  { %938 = vadd.xlane.f32.xlu1 %v937_v34  ;;  %v1067_v41 = vsel %vm664_vm14, %v1060_v10, 0.0  ;;  %v1068_v42 = vsel %vm664_vm14, %v1064_v35, 0.0  ;;  %v1048_v44 = vsel %vm664_vm14, %v1041_v18, 0.0  ;;  %v969_v18 = vstv %s1700_s11 }
 0x292   :  { %v1069_v45 = vadd.f32 %v1068_v42, %v1067_v41  ;;  %v1049_v47 = vsel %vm664_vm14, %v1045_v40, 0.0  ;;  %v1078_v40 = vstv %s1702_s5 }
 0x293   :  { %v1050_v49 = vadd.f32 %v1049_v47, %v1048_v44 }
 0x294   :  { %1070 = vadd.xlane.f32.xlu0 %v1069_v45 }
 0x295   :  { %1051 = vadd.xlane.f32.xlu1 %v1050_v49 }
 0x315   :  { %v713_v50 = vpop.xlane.xlu1 %712  ;;  %v732_v51 = vpop.xlane.xlu0 %731 }
 0x316   :  { %v733_v48 = vadd.f32 %v732_v51, %v713_v50 }
 0x318   :  { %v734_v52 = vmul.f32 0.001953125, %v733_v48  ;;  %v1171_v48 = vld [vmem:[%s1781_s6 + $0x6] ss:$8 sm:$0x3] }
 0x319   :  { %v845_v53 = vpop.xlane.xlu0 %844 }
 0x31a   :  { %v735_v55 = vmax.f32 %v734_v52, 0.0  ;;  %v826_v7 = vpop.xlane.xlu1 %825 }
 0x31b   :  { %v846_v56 = vadd.f32 %v845_v53, %v826_v7 }
 0x31c   :  { %v737_v57 = vadd.f32 1e-05, %v735_v55  ;;  %v1082_v55 = vstv %s1711_s1 }
 0x31d   :  { %v847_v58 = vmul.f32 0.001953125, %v846_v56  ;;  %v958_v59 = vpop.xlane.xlu0 %957 }
 0x31e   :  { %1216 = vrsqrt.f32 %v737_v57  ;;  %v939_v60 = vpop.xlane.xlu1 %938 }
 0x31f   :  { %v848_v61 = vmax.f32 %v847_v58, 0.0  ;;  %v959_v62 = vadd.f32 %v958_v59, %v939_v60 }
 0x321   :  { %v850_v63 = vadd.f32 1e-05, %v848_v61  ;;  %v960_v1 = vmul.f32 0.001953125, %v959_v62  ;;  %v1071_v2 = vpop.xlane.xlu0 %1070 }
 0x322   :  { %v1052_v5 = vpop.xlane.xlu1 %1051 }
 0x323   :  { %1218 = vrsqrt.f32 %v850_v63  ;;  %v961_v8 = vmax.f32 %v960_v1, 0.0  ;;  %v1072_v9 = vadd.f32 %v1071_v2, %v1052_v5 }
 0x325   :  { %v963_v11 = vadd.f32 1e-05, %v961_v8  ;;  %v1073_v12 = vmul.f32 0.001953125, %v1072_v9 }
 0x327   :  { %1220 = vrsqrt.f32 %v963_v11  ;;  %v1074_v14 = vmax.f32 %v1073_v12, 0.0 }
 0x328   :  { %v1217_v0 = vpop.eup %1216 }
 0x329   :  { %v740_v15 = vmul.f32 %v1217_v0, %v739_v13  ;;  %v1076_v17 = vadd.f32 1e-05, %v1074_v14 }
 0x32b   :  { %v742_v20 = vmul.f32 %v740_v15, %v1644_v38  ;;  %v749_v21 = vrot.slane %v740_v15, %v1345_v6  ;;  %1222 = vrsqrt.f32 %v1076_v17 }
 0x32d   :  { %v1219_v25 = vpop.eup %1218  ;;  %v744_v23 = vsub.f32 %v743_v19, %v742_v20  ;;  %v751_v30 = vmul.f32 %v749_v21, %v1552_v28  ;;  %v762_v37 = vmul.f32 %v1157_v26, %v749_v21  ;;  %v1164_v28 = vld [vmem:[%s1781_s6 + $0x5] ss:$8 sm:$0x3] }
 0x32e   :  { %v853_v36 = vmul.f32 %v1219_v25, %v852_v22 }
 0x32f   :  { %v756_v38 = vrot.slane %v744_v23, %v1345_v6 }
 0x330   :  { %v855_v39 = vmul.f32 %v853_v36, %v1648_v16  ;;  %v862_v27 = vrot.slane %v853_v36, %v1345_v6 }
 0x331   :  { %v1221_v33 = vpop.eup %1220  ;;  %v758_v31 = vadd.f32 %v756_v38, %v751_v30  ;;  %v763_v34 = vadd.f32 %v762_v37, %v756_v38 }
 0x332   :  { %v857_v10 = vsub.f32 %v856_v29, %v855_v39  ;;  %v966_v35 = vmul.f32 %v1221_v33, %v965_v3  ;;  %v864_v16 = vmul.f32 %v1557_v32, %v862_v27  ;;  %v875_v42 = vmul.f32 %v1164_v28, %v862_v27 }
 0x333   :  { %759 = vst.msk [vmem:[%s1781_s6] ss:$8 sm:$0x3] %vm1496_vm13, %v758_v31  ;;  %1158 = vst.msk [vmem:[%s1781_s6 + $0x4] ss:$8 sm:$0x3] %vm1496_vm13, %v763_v34 }
 0x334   :  { %v869_v41 = vrot.slane %v857_v10, %v1345_v6  ;;  %v968_v44 = vmul.f32 %v966_v35, %v1654_v46  ;;  %v975_v45 = vrot.slane %v966_v35, %v1345_v6 }
 0x335   :  { %v1223_v47 = vpop.eup %1222 }
 0x336   :  { %v871_v49 = vadd.f32 %v869_v41, %v864_v16  ;;  %v876_v50 = vadd.f32 %v875_v42, %v869_v41  ;;  %v970_v51 = vsub.f32 %v969_v18, %v968_v44  ;;  %v1079_v52 = vmul.f32 %v1223_v47, %v1078_v40 }
 0x337   :  { %v977_v32 = vmul.f32 %v1580_v43, %v975_v45  ;;  %v988_v53 = vmul.f32 %v1171_v48, %v975_v45  ;;  %v1178_v43 = vld [vmem:[%s1781_s6 + $0x7] ss:$8 sm:$0x3] }
 0x338   :  { %1163 = vst.msk [vmem:[%s1781_s6 + $0x1] ss:$8 sm:$0x3] %vm1496_vm13, %v871_v49  ;;  %1165 = vst.msk [vmem:[%s1781_s6 + $0x5] ss:$8 sm:$0x3] %vm1496_vm13, %v876_v50  ;;  %v982_v46 = vrot.slane %v970_v51, %v1345_v6  ;;  %v1081_v7 = vmul.f32 %v1079_v52, %v1668_v4  ;;  %v1088_v56 = vrot.slane %v1079_v52, %v1345_v6 }
 0x33a   :  { %v984_v57 = vadd.f32 %v982_v46, %v977_v32  ;;  %v989_v58 = vadd.f32 %v988_v53, %v982_v46  ;;  %v1083_v59 = vsub.f32 %v1082_v55, %v1081_v7  ;;  %v1090_v4 = vmul.f32 %v1603_v54, %v1088_v56 }
 0x33b   :  { %v1101_v61 = vmul.f32 %v1178_v43, %v1088_v56 }
 0x33c   :  { %1170 = vst.msk [vmem:[%s1781_s6 + $0x2] ss:$8 sm:$0x3] %vm1496_vm13, %v984_v57  ;;  %1172 = vst.msk [vmem:[%s1781_s6 + $0x6] ss:$8 sm:$0x3] %vm1496_vm13, %v989_v58  ;;  %v1095_v60 = vrot.slane %v1083_v59, %v1345_v6 }
 0x33e   :  { %v1097_v62 = vadd.f32 %v1095_v60, %v1090_v4  ;;  %v1102_v63 = vadd.f32 %v1101_v61, %v1095_v60 }
 0x340   :  { %1177 = vst.msk [vmem:[%s1781_s6 + $0x3] ss:$8 sm:$0x3] %vm1496_vm13, %v1097_v62  ;;  %1179 = vst.msk [vmem:[%s1781_s6 + $0x7] ss:$8 sm:$0x3] %vm1496_vm13, %v1102_v63 }
 0x341   :  { %1109 = vsyncpa [#allocation5], 1 }
 0x342   :  { %1110 = vsyncpa [#allocation7], 1 }

</bundles_post_ra>
